<compile_context>
chip_gen: v5e
topology: v5e:2x2
jax: 0.10.0
libtpu: 0.0.40
codegen_flags: <defaults>
</compile_context>

<pallas_src>
import functools

import jax
import jax.numpy as jnp
from jax import lax
from jax.experimental import pallas as pl
from jax.experimental.pallas import tpu as pltpu

EPS = 1e-5          # nn.BatchNorm2d default eps
CPAD = 128          # every channel dim padded to one lane/MXU width
N_ENC = 4           # conv1..conv4   (Based_Encoder.forward)
N_DEC = 4           # tconv2..tconv5 (Based_Decoder.forward)


# ----------------------------------------------------------------------------
# fused kernel
# ----------------------------------------------------------------------------
def _fused_ae_kernel(x_ref, w_ref, g_ref, bt_ref, fb_ref, o_ref, s_ref):
    """Entire autoencoder forward on a VMEM-resident (P0, 128) pixel slab."""
    P = x_ref.shape[0]
    x = x_ref[...]                                           # (P0, 128) f32

    # -------- encoder: (Conv1x1 -> MaxPool2x2 -> BatchNorm) x 4 ------------
    for s in range(N_ENC):
        y = jnp.dot(x, w_ref[s], preferred_element_type=jnp.float32)
        # 2x2 max-pool: the 4 window corners are 4 contiguous row blocks.
        s_ref[0:P, :] = y
        q = P // 4
        y = jnp.maximum(
            jnp.maximum(s_ref[0:q, :], s_ref[q:2 * q, :]),
            jnp.maximum(s_ref[2 * q:3 * q, :], s_ref[3 * q:4 * q, :]))
        # Training-mode BatchNorm (batch stats, biased var, centered).
        # Conv bias omitted: it commutes with max-pool and is cancelled
        # exactly by the mean subtraction.
        mean = jnp.mean(y, axis=0, keepdims=True)
        yc = y - mean
        var = jnp.mean(yc * yc, axis=0, keepdims=True)
        x = yc * (g_ref[s] * lax.rsqrt(var + EPS)) + bt_ref[s]
        P = q

    # -------- decoder: (ConvT1x1 -> Upsample2x -> [BatchNorm]) x 4 ---------
    for d in range(N_DEC):
        s = N_ENC + d
        y = jnp.dot(x, w_ref[s], preferred_element_type=jnp.float32)
        if d < N_DEC - 1:
            # BN applied before replication: nearest-neighbour upsample leaves
            # per-channel batch statistics unchanged, so BN and Upsample
            # commute exactly.  Bias again cancelled by BN.
            mean = jnp.mean(y, axis=0, keepdims=True)
            yc = y - mean
            var = jnp.mean(yc * yc, axis=0, keepdims=True)
            y = yc * (g_ref[s] * lax.rsqrt(var + EPS)) + bt_ref[s]
        else:
            y = y + fb_ref[...]          # tconv5 keeps its bias, no BN
        # 2x nearest upsample == 4 stacked copies in this pixel ordering.
        for r in range(4):
            s_ref[r * P:(r + 1) * P, :] = y
        P = P * 4
        x = s_ref[0:P, :]

    o_ref[...] = x


# ----------------------------------------------------------------------------
# boundary permutations (one-time XLA data movement, outside the kernel)
# ----------------------------------------------------------------------------
def _to_bitrev_rows(x_nhwc):
    """(N,16,16,C) -> (N*256, C) rows keyed (h0,w0,h1,w1,h2,w2,h3,w3,n)."""
    N, H, W, C = x_nhwc.shape
    assert H == 16 and W == 16
    xb = x_nhwc.reshape(N, 2, 2, 2, 2, 2, 2, 2, 2, C)   # (N,h3,h2,h1,h0,w3,w2,w1,w0,C)
    xb = jnp.transpose(xb, (4, 8, 3, 7, 2, 6, 1, 5, 0, 9))
    return xb.reshape(N * H * W, C)


def _from_bitrev_rows(rows, N):
    """Inverse of _to_bitrev_rows: (N*256, C) -> (N,16,16,C)."""
    C = rows.shape[1]
    yb = rows.reshape(2, 2, 2, 2, 2, 2, 2, 2, N, C)     # (H0,W0,H1,W1,H2,W2,H3,W3,N,C)
    yb = jnp.transpose(yb, (8, 6, 4, 2, 0, 7, 5, 3, 1, 9))
    return yb.reshape(N, 16, 16, C)


# ----------------------------------------------------------------------------
# wrapper
# ----------------------------------------------------------------------------
def autoencoder_forward(x_nchw, packed):
    W, G, BT, FB = packed
    N, C, H, Wd = x_nchw.shape
    P0 = N * H * Wd                                       # 512 pixels
    n_stage = N_ENC + N_DEC

    x_nhwc = jnp.transpose(x_nchw, (0, 2, 3, 1)).astype(jnp.float32)
    x2d = _to_bitrev_rows(x_nhwc)                         # (P0, 3)
    x2d = jnp.pad(x2d, ((0, 0), (0, CPAD - C)))           # lane-dense channels

    out2d = pl.pallas_call(
        _fused_ae_kernel,
        out_shape=jax.ShapeDtypeStruct((P0, CPAD), jnp.float32),
        grid=(1,),
        in_specs=[
            pl.BlockSpec((P0, CPAD), lambda i: (0, 0)),            # pixels
            pl.BlockSpec((n_stage, CPAD, CPAD), lambda i: (0, 0, 0)),  # weights
            pl.BlockSpec((n_stage, 1, CPAD), lambda i: (0, 0, 0)),     # gamma
            pl.BlockSpec((n_stage, 1, CPAD), lambda i: (0, 0, 0)),     # beta
            pl.BlockSpec((1, CPAD), lambda i: (0, 0)),                 # final bias
        ],
        out_specs=pl.BlockSpec((P0, CPAD), lambda i: (0, 0)),
        scratch_shapes=[pltpu.VMEM((P0, CPAD), jnp.float32)],      # staging slab
        compiler_params=pltpu.CompilerParams(
            dimension_semantics=("arbitrary",),
            vmem_limit_bytes=32 * 1024 * 1024,   # explicit budget (fits all gens)
        ),
    )(x2d, W, G, BT, FB)

    y_nhwc = _from_bitrev_rows(out2d[:, :3], N)
    return jnp.transpose(y_nhwc, (0, 3, 1, 2))            # NHWC -> NCHW


# ----------------------------------------------------------------------------
# parameter construction / packing
# ----------------------------------------------------------------------------
def init_params(key):
    enc_dims = [(3, 100), (100, 100), (100, 50), (50, 30)]      # conv1..conv4
    dec_dims = [(30, 50), (50, 100), (100, 100), (100, 3)]      # tconv2..tconv5
    params = {"enc": [], "dec": []}
    for cin, cout in enc_dims:
        key, k1, k2, k3, k4 = jax.random.split(key, 5)
        params["enc"].append(dict(
            w=0.1 * jax.random.normal(k1, (cin, cout), jnp.float32),
            b=0.1 * jax.random.normal(k2, (cout,), jnp.float32),
            gamma=jax.random.uniform(k3, (cout,), jnp.float32, 0.5, 1.5),
            beta=0.1 * jax.random.normal(k4, (cout,), jnp.float32),
        ))
    for idx, (cin, cout) in enumerate(dec_dims):
        key, k1, k2, k3, k4 = jax.random.split(key, 5)
        p = dict(
            w=0.1 * jax.random.normal(k1, (cin, cout), jnp.float32),
            b=0.1 * jax.random.normal(k2, (cout,), jnp.float32),
        )
        if idx < len(dec_dims) - 1:   # last decoder stage (tconv5) has no BN
            p["gamma"] = jax.random.uniform(k3, (cout,), jnp.float32, 0.5, 1.5)
            p["beta"] = 0.1 * jax.random.normal(k4, (cout,), jnp.float32)
        params["dec"].append(p)
    return params


def pack_params(params):
    """Stack per-stage weights, zero-padded to 128 lanes (lane-dense MXU N)."""
    stages = list(params["enc"]) + list(params["dec"])
    S = len(stages)
    W = jnp.zeros((S, CPAD, CPAD), jnp.float32)
    G = jnp.zeros((S, 1, CPAD), jnp.float32)
    BT = jnp.zeros((S, 1, CPAD), jnp.float32)
    FB = jnp.zeros((1, CPAD), jnp.float32)
    for s, p in enumerate(stages):
        cin, cout = p["w"].shape
        W = W.at[s, :cin, :cout].set(p["w"])
        if "gamma" in p:                       # conv followed by BN: bias dropped
            G = G.at[s, 0, :cout].set(p["gamma"])
            BT = BT.at[s, 0, :cout].set(p["beta"])
        else:                                  # final tconv5: bias, no BN
            FB = FB.at[0, :cout].set(p["b"])
    return W, G, BT, FB


# ----------------------------------------------------------------------------
# pure-JAX reference (full fidelity, biases included everywhere)
# ----------------------------------------------------------------------------
def _ref_bn(y, g, beta):
    m = y.mean(axis=(0, 1, 2))
    v = y.var(axis=(0, 1, 2))
    return (y - m) * g / jnp.sqrt(v + EPS) + beta


def ref_forward(x_nchw, params):
    x = jnp.transpose(x_nchw, (0, 2, 3, 1)).astype(jnp.float32)
    for p in params["enc"]:
        y = jnp.einsum("nhwc,co->nhwo", x, p["w"]) + p["b"]
        N, H, W, C = y.shape
        y = y.reshape(N, H // 2, 2, W // 2, 2, C).max(axis=(2, 4))
        x = _ref_bn(y, p["gamma"], p["beta"])
    for k, p in enumerate(params["dec"]):
        y = jnp.einsum("nhwc,co->nhwo", x, p["w"]) + p["b"]
        y = jnp.repeat(jnp.repeat(y, 2, axis=1), 2, axis=2)
        if k < len(params["dec"]) - 1:
            y = _ref_bn(y, p["gamma"], p["beta"])
        x = y
    return jnp.transpose(x, (0, 3, 1, 2))


# ----------------------------------------------------------------------------
if __name__ == "__main__":
    key = jax.random.PRNGKey(0)
    key, kx = jax.random.split(key)
    # NCHW input like PyTorch: batch=2, channels=3, spatial 16x16
    x = jax.random.normal(kx, (2, 3, 16, 16), jnp.float32)
    params = init_params(key)
    packed = pack_params(params)

    fwd = jax.jit(functools.partial(autoencoder_forward, packed=packed))
    out = jax.block_until_ready(fwd(x))

    ref = jax.block_until_ready(ref_forward(x, params))

    assert out.shape == (2, 3, 16, 16), out.shape
    max_err = float(jnp.max(jnp.abs(out - ref)))
    assert jnp.allclose(out, ref, rtol=1e-2, atol=1e-2), max_err
    print("KERNEL_OK")
</pallas_src>

<mosaic_0001>
module attributes {stable_mosaic.version = 11 : i64} {
  func.func @_fused_ae_kernel(%arg0: i32, %arg1: memref<512x128xf32, #tpu.memory_space<vmem>>, %arg2: memref<8x128x128xf32, #tpu.memory_space<vmem>>, %arg3: memref<8x1x128xf32, #tpu.memory_space<vmem>>, %arg4: memref<8x1x128xf32, #tpu.memory_space<vmem>>, %arg5: memref<1x128xf32, #tpu.memory_space<vmem>>, %arg6: memref<512x128xf32, #tpu.memory_space<vmem>>, %arg7: memref<512x128xf32, #tpu.memory_space<vmem>>) attributes {dimension_semantics = [#tpu.dimension_semantics<arbitrary>], iteration_bounds = array<i64: 1>, scalar_prefetch = 0 : i64, scratch_operands = 1 : i64, tpu.core_type = #tpu.core_type<tc>, window_params = [{pipeline_mode = #tpu.pipeline_mode<synchronous>, transform_indices = @transform_0, window_bounds = array<i64: 512, 128>}, {pipeline_mode = #tpu.pipeline_mode<synchronous>, transform_indices = @transform_1, window_bounds = array<i64: 8, 128, 128>}, {pipeline_mode = #tpu.pipeline_mode<synchronous>, transform_indices = @transform_2, window_bounds = array<i64: 8, 1, 128>}, {pipeline_mode = #tpu.pipeline_mode<synchronous>, transform_indices = @transform_3, window_bounds = array<i64: 8, 1, 128>}, {pipeline_mode = #tpu.pipeline_mode<synchronous>, transform_indices = @transform_4, window_bounds = array<i64: 1, 128>}, {pipeline_mode = #tpu.pipeline_mode<synchronous>, transform_indices = @transform_5, window_bounds = array<i64: 512, 128>}]} {
    %c0 = arith.constant 0 : index
    %c0_0 = arith.constant 0 : index
    %0 = vector.load %arg1[%c0, %c0_0] : memref<512x128xf32, #tpu.memory_space<vmem>>, vector<512x128xf32>
    %c0_1 = arith.constant 0 : index
    %c0_2 = arith.constant 0 : index
    %c0_3 = arith.constant 0 : index
    %1 = vector.load %arg2[%c0_1, %c0_2, %c0_3] : memref<8x128x128xf32, #tpu.memory_space<vmem>>, vector<1x128x128xf32>
    %2 = vector.shape_cast %1 : vector<1x128x128xf32> to vector<128x128xf32>
    %cst = arith.constant dense<0.000000e+00> : vector<512x128xf32>
    %3 = tpu.matmul %0, %2, %cst {dimension_numbers = #tpu.dot_dimension_numbers<[1], [0], [0], [1], [0, 0, 1, 1], [], []>} : vector<512x128xf32>, vector<128x128xf32>, vector<512x128xf32> -> vector<512x128xf32>
    %c0_4 = arith.constant 0 : index
    %c0_5 = arith.constant 0 : index
    %4 = vector.load %arg7[%c0_4, %c0_5] : memref<512x128xf32, #tpu.memory_space<vmem>>, vector<512x128xf32>
    tpu.vector_store %arg7[%c0_4, %c0_5], %3 {strides = array<i32>} : memref<512x128xf32, #tpu.memory_space<vmem>>, vector<512x128xf32>,
    %c0_6 = arith.constant 0 : index
    %c0_7 = arith.constant 0 : index
    %5 = vector.load %arg7[%c0_6, %c0_7] : memref<512x128xf32, #tpu.memory_space<vmem>>, vector<128x128xf32>
    %c128 = arith.constant 128 : index
    %c0_8 = arith.constant 0 : index
    %6 = vector.load %arg7[%c128, %c0_8] : memref<512x128xf32, #tpu.memory_space<vmem>>, vector<128x128xf32>
    %7 = arith.maximumf %5, %6 : vector<128x128xf32>
    %c256 = arith.constant 256 : index
    %c0_9 = arith.constant 0 : index
    %8 = vector.load %arg7[%c256, %c0_9] : memref<512x128xf32, #tpu.memory_space<vmem>>, vector<128x128xf32>
    %c384 = arith.constant 384 : index
    %c0_10 = arith.constant 0 : index
    %9 = vector.load %arg7[%c384, %c0_10] : memref<512x128xf32, #tpu.memory_space<vmem>>, vector<128x128xf32>
    %10 = arith.maximumf %8, %9 : vector<128x128xf32>
    %11 = arith.maximumf %7, %10 : vector<128x128xf32>
    %cst_11 = arith.constant dense<0.000000e+00> : vector<128xf32>
    %12 = vector.multi_reduction <add>, %11, %cst_11 [0] : vector<128x128xf32> to vector<128xf32>
    %13 = vector.shape_cast %12 : vector<128xf32> to vector<1x128xf32>
    %cst_12 = arith.constant 1.280000e+02 : f32
    %14 = vector.broadcast %cst_12 : f32 to vector<1x128xf32>
    %15 = arith.divf %13, %14 : vector<1x128xf32>
    %16 = vector.broadcast %15 : vector<1x128xf32> to vector<128x128xf32>
    %17 = arith.subf %11, %16 : vector<128x128xf32>
    %18 = arith.mulf %17, %17 : vector<128x128xf32>
    %cst_13 = arith.constant dense<0.000000e+00> : vector<128xf32>
    %19 = vector.multi_reduction <add>, %18, %cst_13 [0] : vector<128x128xf32> to vector<128xf32>
    %20 = vector.shape_cast %19 : vector<128xf32> to vector<1x128xf32>
    %cst_14 = arith.constant 1.280000e+02 : f32
    %21 = vector.broadcast %cst_14 : f32 to vector<1x128xf32>
    %22 = arith.divf %20, %21 : vector<1x128xf32>
    %c0_15 = arith.constant 0 : index
    %c0_16 = arith.constant 0 : index
    %c0_17 = arith.constant 0 : index
    %23 = vector.load %arg3[%c0_15, %c0_16, %c0_17] : memref<8x1x128xf32, #tpu.memory_space<vmem>>, vector<1x1x128xf32>
    %24 = vector.shape_cast %23 : vector<1x1x128xf32> to vector<1x128xf32>
    %cst_18 = arith.constant 9.99999974E-6 : f32
    %25 = vector.broadcast %cst_18 : f32 to vector<1x128xf32>
    %26 = arith.addf %22, %25 : vector<1x128xf32>
    %27 = math.rsqrt %26 : vector<1x128xf32>
    %28 = arith.mulf %24, %27 : vector<1x128xf32>
    %29 = vector.broadcast %28 : vector<1x128xf32> to vector<128x128xf32>
    %30 = arith.mulf %17, %29 : vector<128x128xf32>
    %c0_19 = arith.constant 0 : index
    %c0_20 = arith.constant 0 : index
    %c0_21 = arith.constant 0 : index
    %31 = vector.load %arg4[%c0_19, %c0_20, %c0_21] : memref<8x1x128xf32, #tpu.memory_space<vmem>>, vector<1x1x128xf32>
    %32 = vector.shape_cast %31 : vector<1x1x128xf32> to vector<1x128xf32>
    %33 = vector.broadcast %32 : vector<1x128xf32> to vector<128x128xf32>
    %34 = arith.addf %30, %33 : vector<128x128xf32>
    %c1 = arith.constant 1 : index
    %c0_22 = arith.constant 0 : index
    %c0_23 = arith.constant 0 : index
    %35 = vector.load %arg2[%c1, %c0_22, %c0_23] : memref<8x128x128xf32, #tpu.memory_space<vmem>>, vector<1x128x128xf32>
    %36 = vector.shape_cast %35 : vector<1x128x128xf32> to vector<128x128xf32>
    %cst_24 = arith.constant dense<0.000000e+00> : vector<128x128xf32>
    %37 = tpu.matmul %34, %36, %cst_24 {dimension_numbers = #tpu.dot_dimension_numbers<[1], [0], [0], [1], [0, 0, 1, 1], [], []>} : vector<128x128xf32>, vector<128x128xf32>, vector<128x128xf32> -> vector<128x128xf32>
    %c0_25 = arith.constant 0 : index
    %c0_26 = arith.constant 0 : index
    %38 = vector.load %arg7[%c0_25, %c0_26] : memref<512x128xf32, #tpu.memory_space<vmem>>, vector<128x128xf32>
    tpu.vector_store %arg7[%c0_25, %c0_26], %37 {strides = array<i32>} : memref<512x128xf32, #tpu.memory_space<vmem>>, vector<128x128xf32>,
    %c0_27 = arith.constant 0 : index
    %c0_28 = arith.constant 0 : index
    %39 = vector.load %arg7[%c0_27, %c0_28] : memref<512x128xf32, #tpu.memory_space<vmem>>, vector<32x128xf32>
    %c32 = arith.constant 32 : index
    %c0_29 = arith.constant 0 : index
    %40 = vector.load %arg7[%c32, %c0_29] : memref<512x128xf32, #tpu.memory_space<vmem>>, vector<32x128xf32>
    %41 = arith.maximumf %39, %40 : vector<32x128xf32>
    %c64 = arith.constant 64 : index
    %c0_30 = arith.constant 0 : index
    %42 = vector.load %arg7[%c64, %c0_30] : memref<512x128xf32, #tpu.memory_space<vmem>>, vector<32x128xf32>
    %c96 = arith.constant 96 : index
    %c0_31 = arith.constant 0 : index
    %43 = vector.load %arg7[%c96, %c0_31] : memref<512x128xf32, #tpu.memory_space<vmem>>, vector<32x128xf32>
    %44 = arith.maximumf %42, %43 : vector<32x128xf32>
    %45 = arith.maximumf %41, %44 : vector<32x128xf32>
    %cst_32 = arith.constant dense<0.000000e+00> : vector<128xf32>
    %46 = vector.multi_reduction <add>, %45, %cst_32 [0] : vector<32x128xf32> to vector<128xf32>
    %47 = vector.shape_cast %46 : vector<128xf32> to vector<1x128xf32>
    %cst_33 = arith.constant 3.200000e+01 : f32
    %48 = vector.broadcast %cst_33 : f32 to vector<1x128xf32>
    %49 = arith.divf %47, %48 : vector<1x128xf32>
    %50 = vector.broadcast %49 : vector<1x128xf32> to vector<32x128xf32>
    %51 = arith.subf %45, %50 : vector<32x128xf32>
    %52 = arith.mulf %51, %51 : vector<32x128xf32>
    %cst_34 = arith.constant dense<0.000000e+00> : vector<128xf32>
    %53 = vector.multi_reduction <add>, %52, %cst_34 [0] : vector<32x128xf32> to vector<128xf32>
    %54 = vector.shape_cast %53 : vector<128xf32> to vector<1x128xf32>
    %cst_35 = arith.constant 3.200000e+01 : f32
    %55 = vector.broadcast %cst_35 : f32 to vector<1x128xf32>
    %56 = arith.divf %54, %55 : vector<1x128xf32>
    %c1_36 = arith.constant 1 : index
    %c0_37 = arith.constant 0 : index
    %c0_38 = arith.constant 0 : index
    %57 = vector.load %arg3[%c1_36, %c0_37, %c0_38] : memref<8x1x128xf32, #tpu.memory_space<vmem>>, vector<1x1x128xf32>
    %58 = vector.shape_cast %57 : vector<1x1x128xf32> to vector<1x128xf32>
    %cst_39 = arith.constant 9.99999974E-6 : f32
    %59 = vector.broadcast %cst_39 : f32 to vector<1x128xf32>
    %60 = arith.addf %56, %59 : vector<1x128xf32>
    %61 = math.rsqrt %60 : vector<1x128xf32>
    %62 = arith.mulf %58, %61 : vector<1x128xf32>
    %63 = vector.broadcast %62 : vector<1x128xf32> to vector<32x128xf32>
    %64 = arith.mulf %51, %63 : vector<32x128xf32>
    %c1_40 = arith.constant 1 : index
    %c0_41 = arith.constant 0 : index
    %c0_42 = arith.constant 0 : index
    %65 = vector.load %arg4[%c1_40, %c0_41, %c0_42] : memref<8x1x128xf32, #tpu.memory_space<vmem>>, vector<1x1x128xf32>
    %66 = vector.shape_cast %65 : vector<1x1x128xf32> to vector<1x128xf32>
    %67 = vector.broadcast %66 : vector<1x128xf32> to vector<32x128xf32>
    %68 = arith.addf %64, %67 : vector<32x128xf32>
    %c2 = arith.constant 2 : index
    %c0_43 = arith.constant 0 : index
    %c0_44 = arith.constant 0 : index
    %69 = vector.load %arg2[%c2, %c0_43, %c0_44] : memref<8x128x128xf32, #tpu.memory_space<vmem>>, vector<1x128x128xf32>
    %70 = vector.shape_cast %69 : vector<1x128x128xf32> to vector<128x128xf32>
    %cst_45 = arith.constant dense<0.000000e+00> : vector<32x128xf32>
    %71 = tpu.matmul %68, %70, %cst_45 {dimension_numbers = #tpu.dot_dimension_numbers<[1], [0], [0], [1], [0, 0, 1, 1], [], []>} : vector<32x128xf32>, vector<128x128xf32>, vector<32x128xf32> -> vector<32x128xf32>
    %c0_46 = arith.constant 0 : index
    %c0_47 = arith.constant 0 : index
    %72 = vector.load %arg7[%c0_46, %c0_47] : memref<512x128xf32, #tpu.memory_space<vmem>>, vector<32x128xf32>
    tpu.vector_store %arg7[%c0_46, %c0_47], %71 {strides = array<i32>} : memref<512x128xf32, #tpu.memory_space<vmem>>, vector<32x128xf32>,
    %c0_48 = arith.constant 0 : index
    %c0_49 = arith.constant 0 : index
    %73 = vector.load %arg7[%c0_48, %c0_49] : memref<512x128xf32, #tpu.memory_space<vmem>>, vector<8x128xf32>
    %c8 = arith.constant 8 : index
    %c0_50 = arith.constant 0 : index
    %74 = vector.load %arg7[%c8, %c0_50] : memref<512x128xf32, #tpu.memory_space<vmem>>, vector<8x128xf32>
    %75 = arith.maximumf %73, %74 : vector<8x128xf32>
    %c16 = arith.constant 16 : index
    %c0_51 = arith.constant 0 : index
    %76 = vector.load %arg7[%c16, %c0_51] : memref<512x128xf32, #tpu.memory_space<vmem>>, vector<8x128xf32>
    %c24 = arith.constant 24 : index
    %c0_52 = arith.constant 0 : index
    %77 = vector.load %arg7[%c24, %c0_52] : memref<512x128xf32, #tpu.memory_space<vmem>>, vector<8x128xf32>
    %78 = arith.maximumf %76, %77 : vector<8x128xf32>
    %79 = arith.maximumf %75, %78 : vector<8x128xf32>
    %cst_53 = arith.constant dense<0.000000e+00> : vector<128xf32>
    %80 = vector.multi_reduction <add>, %79, %cst_53 [0] : vector<8x128xf32> to vector<128xf32>
    %81 = vector.shape_cast %80 : vector<128xf32> to vector<1x128xf32>
    %cst_54 = arith.constant 8.000000e+00 : f32
    %82 = vector.broadcast %cst_54 : f32 to vector<1x128xf32>
    %83 = arith.divf %81, %82 : vector<1x128xf32>
    %84 = vector.broadcast %83 : vector<1x128xf32> to vector<8x128xf32>
    %85 = arith.subf %79, %84 : vector<8x128xf32>
    %86 = arith.mulf %85, %85 : vector<8x128xf32>
    %cst_55 = arith.constant dense<0.000000e+00> : vector<128xf32>
    %87 = vector.multi_reduction <add>, %86, %cst_55 [0] : vector<8x128xf32> to vector<128xf32>
    %88 = vector.shape_cast %87 : vector<128xf32> to vector<1x128xf32>
    %cst_56 = arith.constant 8.000000e+00 : f32
    %89 = vector.broadcast %cst_56 : f32 to vector<1x128xf32>
    %90 = arith.divf %88, %89 : vector<1x128xf32>
    %c2_57 = arith.constant 2 : index
    %c0_58 = arith.constant 0 : index
    %c0_59 = arith.constant 0 : index
    %91 = vector.load %arg3[%c2_57, %c0_58, %c0_59] : memref<8x1x128xf32, #tpu.memory_space<vmem>>, vector<1x1x128xf32>
    %92 = vector.shape_cast %91 : vector<1x1x128xf32> to vector<1x128xf32>
    %cst_60 = arith.constant 9.99999974E-6 : f32
    %93 = vector.broadcast %cst_60 : f32 to vector<1x128xf32>
    %94 = arith.addf %90, %93 : vector<1x128xf32>
    %95 = math.rsqrt %94 : vector<1x128xf32>
    %96 = arith.mulf %92, %95 : vector<1x128xf32>
    %97 = vector.broadcast %96 : vector<1x128xf32> to vector<8x128xf32>
    %98 = arith.mulf %85, %97 : vector<8x128xf32>
    %c2_61 = arith.constant 2 : index
    %c0_62 = arith.constant 0 : index
    %c0_63 = arith.constant 0 : index
    %99 = vector.load %arg4[%c2_61, %c0_62, %c0_63] : memref<8x1x128xf32, #tpu.memory_space<vmem>>, vector<1x1x128xf32>
    %100 = vector.shape_cast %99 : vector<1x1x128xf32> to vector<1x128xf32>
    %101 = vector.broadcast %100 : vector<1x128xf32> to vector<8x128xf32>
    %102 = arith.addf %98, %101 : vector<8x128xf32>
    %c3 = arith.constant 3 : index
    %c0_64 = arith.constant 0 : index
    %c0_65 = arith.constant 0 : index
    %103 = vector.load %arg2[%c3, %c0_64, %c0_65] : memref<8x128x128xf32, #tpu.memory_space<vmem>>, vector<1x128x128xf32>
    %104 = vector.shape_cast %103 : vector<1x128x128xf32> to vector<128x128xf32>
    %cst_66 = arith.constant dense<0.000000e+00> : vector<8x128xf32>
    %105 = tpu.matmul %102, %104, %cst_66 {dimension_numbers = #tpu.dot_dimension_numbers<[1], [0], [0], [1], [0, 0, 1, 1], [], []>} : vector<8x128xf32>, vector<128x128xf32>, vector<8x128xf32> -> vector<8x128xf32>
    %c0_67 = arith.constant 0 : index
    %c0_68 = arith.constant 0 : index
    %106 = vector.load %arg7[%c0_67, %c0_68] : memref<512x128xf32, #tpu.memory_space<vmem>>, vector<8x128xf32>
    tpu.vector_store %arg7[%c0_67, %c0_68], %105 {strides = array<i32>} : memref<512x128xf32, #tpu.memory_space<vmem>>, vector<8x128xf32>,
    %c0_69 = arith.constant 0 : index
    %c0_70 = arith.constant 0 : index
    %107 = vector.load %arg7[%c0_69, %c0_70] : memref<512x128xf32, #tpu.memory_space<vmem>>, vector<2x128xf32>
    %c2_71 = arith.constant 2 : index
    %c0_72 = arith.constant 0 : index
    %108 = vector.load %arg7[%c2_71, %c0_72] : memref<512x128xf32, #tpu.memory_space<vmem>>, vector<2x128xf32>
    %109 = arith.maximumf %107, %108 : vector<2x128xf32>
    %c4 = arith.constant 4 : index
    %c0_73 = arith.constant 0 : index
    %110 = vector.load %arg7[%c4, %c0_73] : memref<512x128xf32, #tpu.memory_space<vmem>>, vector<2x128xf32>
    %c6 = arith.constant 6 : index
    %c0_74 = arith.constant 0 : index
    %111 = vector.load %arg7[%c6, %c0_74] : memref<512x128xf32, #tpu.memory_space<vmem>>, vector<2x128xf32>
    %112 = arith.maximumf %110, %111 : vector<2x128xf32>
    %113 = arith.maximumf %109, %112 : vector<2x128xf32>
    %cst_75 = arith.constant dense<0.000000e+00> : vector<128xf32>
    %114 = vector.multi_reduction <add>, %113, %cst_75 [0] : vector<2x128xf32> to vector<128xf32>
    %115 = vector.shape_cast %114 : vector<128xf32> to vector<1x128xf32>
    %cst_76 = arith.constant 2.000000e+00 : f32
    %116 = vector.broadcast %cst_76 : f32 to vector<1x128xf32>
    %117 = arith.divf %115, %116 : vector<1x128xf32>
    %118 = vector.broadcast %117 : vector<1x128xf32> to vector<2x128xf32>
    %119 = arith.subf %113, %118 : vector<2x128xf32>
    %120 = arith.mulf %119, %119 : vector<2x128xf32>
    %cst_77 = arith.constant dense<0.000000e+00> : vector<128xf32>
    %121 = vector.multi_reduction <add>, %120, %cst_77 [0] : vector<2x128xf32> to vector<128xf32>
    %122 = vector.shape_cast %121 : vector<128xf32> to vector<1x128xf32>
    %cst_78 = arith.constant 2.000000e+00 : f32
    %123 = vector.broadcast %cst_78 : f32 to vector<1x128xf32>
    %124 = arith.divf %122, %123 : vector<1x128xf32>
    %c3_79 = arith.constant 3 : index
    %c0_80 = arith.constant 0 : index
    %c0_81 = arith.constant 0 : index
    %125 = vector.load %arg3[%c3_79, %c0_80, %c0_81] : memref<8x1x128xf32, #tpu.memory_space<vmem>>, vector<1x1x128xf32>
    %126 = vector.shape_cast %125 : vector<1x1x128xf32> to vector<1x128xf32>
    %cst_82 = arith.constant 9.99999974E-6 : f32
    %127 = vector.broadcast %cst_82 : f32 to vector<1x128xf32>
    %128 = arith.addf %124, %127 : vector<1x128xf32>
    %129 = math.rsqrt %128 : vector<1x128xf32>
    %130 = arith.mulf %126, %129 : vector<1x128xf32>
    %131 = vector.broadcast %130 : vector<1x128xf32> to vector<2x128xf32>
    %132 = arith.mulf %119, %131 : vector<2x128xf32>
    %c3_83 = arith.constant 3 : index
    %c0_84 = arith.constant 0 : index
    %c0_85 = arith.constant 0 : index
    %133 = vector.load %arg4[%c3_83, %c0_84, %c0_85] : memref<8x1x128xf32, #tpu.memory_space<vmem>>, vector<1x1x128xf32>
    %134 = vector.shape_cast %133 : vector<1x1x128xf32> to vector<1x128xf32>
    %135 = vector.broadcast %134 : vector<1x128xf32> to vector<2x128xf32>
    %136 = arith.addf %132, %135 : vector<2x128xf32>
    %c4_86 = arith.constant 4 : index
    %c0_87 = arith.constant 0 : index
    %c0_88 = arith.constant 0 : index
    %137 = vector.load %arg2[%c4_86, %c0_87, %c0_88] : memref<8x128x128xf32, #tpu.memory_space<vmem>>, vector<1x128x128xf32>
    %138 = vector.shape_cast %137 : vector<1x128x128xf32> to vector<128x128xf32>
    %cst_89 = arith.constant dense<0.000000e+00> : vector<2x128xf32>
    %139 = tpu.matmul %136, %138, %cst_89 {dimension_numbers = #tpu.dot_dimension_numbers<[1], [0], [0], [1], [0, 0, 1, 1], [], []>} : vector<2x128xf32>, vector<128x128xf32>, vector<2x128xf32> -> vector<2x128xf32>
    %cst_90 = arith.constant dense<0.000000e+00> : vector<128xf32>
    %140 = vector.multi_reduction <add>, %139, %cst_90 [0] : vector<2x128xf32> to vector<128xf32>
    %141 = vector.shape_cast %140 : vector<128xf32> to vector<1x128xf32>
    %cst_91 = arith.constant 2.000000e+00 : f32
    %142 = vector.broadcast %cst_91 : f32 to vector<1x128xf32>
    %143 = arith.divf %141, %142 : vector<1x128xf32>
    %144 = vector.broadcast %143 : vector<1x128xf32> to vector<2x128xf32>
    %145 = arith.subf %139, %144 : vector<2x128xf32>
    %146 = arith.mulf %145, %145 : vector<2x128xf32>
    %cst_92 = arith.constant dense<0.000000e+00> : vector<128xf32>
    %147 = vector.multi_reduction <add>, %146, %cst_92 [0] : vector<2x128xf32> to vector<128xf32>
    %148 = vector.shape_cast %147 : vector<128xf32> to vector<1x128xf32>
    %cst_93 = arith.constant 2.000000e+00 : f32
    %149 = vector.broadcast %cst_93 : f32 to vector<1x128xf32>
    %150 = arith.divf %148, %149 : vector<1x128xf32>
    %c4_94 = arith.constant 4 : index
    %c0_95 = arith.constant 0 : index
    %c0_96 = arith.constant 0 : index
    %151 = vector.load %arg3[%c4_94, %c0_95, %c0_96] : memref<8x1x128xf32, #tpu.memory_space<vmem>>, vector<1x1x128xf32>
    %152 = vector.shape_cast %151 : vector<1x1x128xf32> to vector<1x128xf32>
    %cst_97 = arith.constant 9.99999974E-6 : f32
    %153 = vector.broadcast %cst_97 : f32 to vector<1x128xf32>
    %154 = arith.addf %150, %153 : vector<1x128xf32>
    %155 = math.rsqrt %154 : vector<1x128xf32>
    %156 = arith.mulf %152, %155 : vector<1x128xf32>
    %157 = vector.broadcast %156 : vector<1x128xf32> to vector<2x128xf32>
    %158 = arith.mulf %145, %157 : vector<2x128xf32>
    %c4_98 = arith.constant 4 : index
    %c0_99 = arith.constant 0 : index
    %c0_100 = arith.constant 0 : index
    %159 = vector.load %arg4[%c4_98, %c0_99, %c0_100] : memref<8x1x128xf32, #tpu.memory_space<vmem>>, vector<1x1x128xf32>
    %160 = vector.shape_cast %159 : vector<1x1x128xf32> to vector<1x128xf32>
    %161 = vector.broadcast %160 : vector<1x128xf32> to vector<2x128xf32>
    %162 = arith.addf %158, %161 : vector<2x128xf32>
    %c0_101 = arith.constant 0 : index
    %c0_102 = arith.constant 0 : index
    %163 = vector.load %arg7[%c0_101, %c0_102] : memref<512x128xf32, #tpu.memory_space<vmem>>, vector<2x128xf32>
    tpu.vector_store %arg7[%c0_101, %c0_102], %162 {strides = array<i32>} : memref<512x128xf32, #tpu.memory_space<vmem>>, vector<2x128xf32>,
    %c2_103 = arith.constant 2 : index
    %c0_104 = arith.constant 0 : index
    %164 = vector.load %arg7[%c2_103, %c0_104] : memref<512x128xf32, #tpu.memory_space<vmem>>, vector<2x128xf32>
    tpu.vector_store %arg7[%c2_103, %c0_104], %162 {strides = array<i32>} : memref<512x128xf32, #tpu.memory_space<vmem>>, vector<2x128xf32>,
    %c4_105 = arith.constant 4 : index
    %c0_106 = arith.constant 0 : index
    %165 = vector.load %arg7[%c4_105, %c0_106] : memref<512x128xf32, #tpu.memory_space<vmem>>, vector<2x128xf32>
    tpu.vector_store %arg7[%c4_105, %c0_106], %162 {strides = array<i32>} : memref<512x128xf32, #tpu.memory_space<vmem>>, vector<2x128xf32>,
    %c6_107 = arith.constant 6 : index
    %c0_108 = arith.constant 0 : index
    %166 = vector.load %arg7[%c6_107, %c0_108] : memref<512x128xf32, #tpu.memory_space<vmem>>, vector<2x128xf32>
    tpu.vector_store %arg7[%c6_107, %c0_108], %162 {strides = array<i32>} : memref<512x128xf32, #tpu.memory_space<vmem>>, vector<2x128xf32>,
    %c0_109 = arith.constant 0 : index
    %c0_110 = arith.constant 0 : index
    %167 = vector.load %arg7[%c0_109, %c0_110] : memref<512x128xf32, #tpu.memory_space<vmem>>, vector<8x128xf32>
    %c5 = arith.constant 5 : index
    %c0_111 = arith.constant 0 : index
    %c0_112 = arith.constant 0 : index
    %168 = vector.load %arg2[%c5, %c0_111, %c0_112] : memref<8x128x128xf32, #tpu.memory_space<vmem>>, vector<1x128x128xf32>
    %169 = vector.shape_cast %168 : vector<1x128x128xf32> to vector<128x128xf32>
    %cst_113 = arith.constant dense<0.000000e+00> : vector<8x128xf32>
    %170 = tpu.matmul %167, %169, %cst_113 {dimension_numbers = #tpu.dot_dimension_numbers<[1], [0], [0], [1], [0, 0, 1, 1], [], []>} : vector<8x128xf32>, vector<128x128xf32>, vector<8x128xf32> -> vector<8x128xf32>
    %cst_114 = arith.constant dense<0.000000e+00> : vector<128xf32>
    %171 = vector.multi_reduction <add>, %170, %cst_114 [0] : vector<8x128xf32> to vector<128xf32>
    %172 = vector.shape_cast %171 : vector<128xf32> to vector<1x128xf32>
    %cst_115 = arith.constant 8.000000e+00 : f32
    %173 = vector.broadcast %cst_115 : f32 to vector<1x128xf32>
    %174 = arith.divf %172, %173 : vector<1x128xf32>
    %175 = vector.broadcast %174 : vector<1x128xf32> to vector<8x128xf32>
    %176 = arith.subf %170, %175 : vector<8x128xf32>
    %177 = arith.mulf %176, %176 : vector<8x128xf32>
    %cst_116 = arith.constant dense<0.000000e+00> : vector<128xf32>
    %178 = vector.multi_reduction <add>, %177, %cst_116 [0] : vector<8x128xf32> to vector<128xf32>
    %179 = vector.shape_cast %178 : vector<128xf32> to vector<1x128xf32>
    %cst_117 = arith.constant 8.000000e+00 : f32
    %180 = vector.broadcast %cst_117 : f32 to vector<1x128xf32>
    %181 = arith.divf %179, %180 : vector<1x128xf32>
    %c5_118 = arith.constant 5 : index
    %c0_119 = arith.constant 0 : index
    %c0_120 = arith.constant 0 : index
    %182 = vector.load %arg3[%c5_118, %c0_119, %c0_120] : memref<8x1x128xf32, #tpu.memory_space<vmem>>, vector<1x1x128xf32>
    %183 = vector.shape_cast %182 : vector<1x1x128xf32> to vector<1x128xf32>
    %cst_121 = arith.constant 9.99999974E-6 : f32
    %184 = vector.broadcast %cst_121 : f32 to vector<1x128xf32>
    %185 = arith.addf %181, %184 : vector<1x128xf32>
    %186 = math.rsqrt %185 : vector<1x128xf32>
    %187 = arith.mulf %183, %186 : vector<1x128xf32>
    %188 = vector.broadcast %187 : vector<1x128xf32> to vector<8x128xf32>
    %189 = arith.mulf %176, %188 : vector<8x128xf32>
    %c5_122 = arith.constant 5 : index
    %c0_123 = arith.constant 0 : index
    %c0_124 = arith.constant 0 : index
    %190 = vector.load %arg4[%c5_122, %c0_123, %c0_124] : memref<8x1x128xf32, #tpu.memory_space<vmem>>, vector<1x1x128xf32>
    %191 = vector.shape_cast %190 : vector<1x1x128xf32> to vector<1x128xf32>
    %192 = vector.broadcast %191 : vector<1x128xf32> to vector<8x128xf32>
    %193 = arith.addf %189, %192 : vector<8x128xf32>
    %c0_125 = arith.constant 0 : index
    %c0_126 = arith.constant 0 : index
    %194 = vector.load %arg7[%c0_125, %c0_126] : memref<512x128xf32, #tpu.memory_space<vmem>>, vector<8x128xf32>
    tpu.vector_store %arg7[%c0_125, %c0_126], %193 {strides = array<i32>} : memref<512x128xf32, #tpu.memory_space<vmem>>, vector<8x128xf32>,
    %c8_127 = arith.constant 8 : index
    %c0_128 = arith.constant 0 : index
    %195 = vector.load %arg7[%c8_127, %c0_128] : memref<512x128xf32, #tpu.memory_space<vmem>>, vector<8x128xf32>
    tpu.vector_store %arg7[%c8_127, %c0_128], %193 {strides = array<i32>} : memref<512x128xf32, #tpu.memory_space<vmem>>, vector<8x128xf32>,
    %c16_129 = arith.constant 16 : index
    %c0_130 = arith.constant 0 : index
    %196 = vector.load %arg7[%c16_129, %c0_130] : memref<512x128xf32, #tpu.memory_space<vmem>>, vector<8x128xf32>
    tpu.vector_store %arg7[%c16_129, %c0_130], %193 {strides = array<i32>} : memref<512x128xf32, #tpu.memory_space<vmem>>, vector<8x128xf32>,
    %c24_131 = arith.constant 24 : index
    %c0_132 = arith.constant 0 : index
    %197 = vector.load %arg7[%c24_131, %c0_132] : memref<512x128xf32, #tpu.memory_space<vmem>>, vector<8x128xf32>
    tpu.vector_store %arg7[%c24_131, %c0_132], %193 {strides = array<i32>} : memref<512x128xf32, #tpu.memory_space<vmem>>, vector<8x128xf32>,
    %c0_133 = arith.constant 0 : index
    %c0_134 = arith.constant 0 : index
    %198 = vector.load %arg7[%c0_133, %c0_134] : memref<512x128xf32, #tpu.memory_space<vmem>>, vector<32x128xf32>
    %c6_135 = arith.constant 6 : index
    %c0_136 = arith.constant 0 : index
    %c0_137 = arith.constant 0 : index
    %199 = vector.load %arg2[%c6_135, %c0_136, %c0_137] : memref<8x128x128xf32, #tpu.memory_space<vmem>>, vector<1x128x128xf32>
    %200 = vector.shape_cast %199 : vector<1x128x128xf32> to vector<128x128xf32>
    %cst_138 = arith.constant dense<0.000000e+00> : vector<32x128xf32>
    %201 = tpu.matmul %198, %200, %cst_138 {dimension_numbers = #tpu.dot_dimension_numbers<[1], [0], [0], [1], [0, 0, 1, 1], [], []>} : vector<32x128xf32>, vector<128x128xf32>, vector<32x128xf32> -> vector<32x128xf32>
    %cst_139 = arith.constant dense<0.000000e+00> : vector<128xf32>
    %202 = vector.multi_reduction <add>, %201, %cst_139 [0] : vector<32x128xf32> to vector<128xf32>
    %203 = vector.shape_cast %202 : vector<128xf32> to vector<1x128xf32>
    %cst_140 = arith.constant 3.200000e+01 : f32
    %204 = vector.broadcast %cst_140 : f32 to vector<1x128xf32>
    %205 = arith.divf %203, %204 : vector<1x128xf32>
    %206 = vector.broadcast %205 : vector<1x128xf32> to vector<32x128xf32>
    %207 = arith.subf %201, %206 : vector<32x128xf32>
    %208 = arith.mulf %207, %207 : vector<32x128xf32>
    %cst_141 = arith.constant dense<0.000000e+00> : vector<128xf32>
    %209 = vector.multi_reduction <add>, %208, %cst_141 [0] : vector<32x128xf32> to vector<128xf32>
    %210 = vector.shape_cast %209 : vector<128xf32> to vector<1x128xf32>
    %cst_142 = arith.constant 3.200000e+01 : f32
    %211 = vector.broadcast %cst_142 : f32 to vector<1x128xf32>
    %212 = arith.divf %210, %211 : vector<1x128xf32>
    %c6_143 = arith.constant 6 : index
    %c0_144 = arith.constant 0 : index
    %c0_145 = arith.constant 0 : index
    %213 = vector.load %arg3[%c6_143, %c0_144, %c0_145] : memref<8x1x128xf32, #tpu.memory_space<vmem>>, vector<1x1x128xf32>
    %214 = vector.shape_cast %213 : vector<1x1x128xf32> to vector<1x128xf32>
    %cst_146 = arith.constant 9.99999974E-6 : f32
    %215 = vector.broadcast %cst_146 : f32 to vector<1x128xf32>
    %216 = arith.addf %212, %215 : vector<1x128xf32>
    %217 = math.rsqrt %216 : vector<1x128xf32>
    %218 = arith.mulf %214, %217 : vector<1x128xf32>
    %219 = vector.broadcast %218 : vector<1x128xf32> to vector<32x128xf32>
    %220 = arith.mulf %207, %219 : vector<32x128xf32>
    %c6_147 = arith.constant 6 : index
    %c0_148 = arith.constant 0 : index
    %c0_149 = arith.constant 0 : index
    %221 = vector.load %arg4[%c6_147, %c0_148, %c0_149] : memref<8x1x128xf32, #tpu.memory_space<vmem>>, vector<1x1x128xf32>
    %222 = vector.shape_cast %221 : vector<1x1x128xf32> to vector<1x128xf32>
    %223 = vector.broadcast %222 : vector<1x128xf32> to vector<32x128xf32>
    %224 = arith.addf %220, %223 : vector<32x128xf32>
    %c0_150 = arith.constant 0 : index
    %c0_151 = arith.constant 0 : index
    %225 = vector.load %arg7[%c0_150, %c0_151] : memref<512x128xf32, #tpu.memory_space<vmem>>, vector<32x128xf32>
    tpu.vector_store %arg7[%c0_150, %c0_151], %224 {strides = array<i32>} : memref<512x128xf32, #tpu.memory_space<vmem>>, vector<32x128xf32>,
    %c32_152 = arith.constant 32 : index
    %c0_153 = arith.constant 0 : index
    %226 = vector.load %arg7[%c32_152, %c0_153] : memref<512x128xf32, #tpu.memory_space<vmem>>, vector<32x128xf32>
    tpu.vector_store %arg7[%c32_152, %c0_153], %224 {strides = array<i32>} : memref<512x128xf32, #tpu.memory_space<vmem>>, vector<32x128xf32>,
    %c64_154 = arith.constant 64 : index
    %c0_155 = arith.constant 0 : index
    %227 = vector.load %arg7[%c64_154, %c0_155] : memref<512x128xf32, #tpu.memory_space<vmem>>, vector<32x128xf32>
    tpu.vector_store %arg7[%c64_154, %c0_155], %224 {strides = array<i32>} : memref<512x128xf32, #tpu.memory_space<vmem>>, vector<32x128xf32>,
    %c96_156 = arith.constant 96 : index
    %c0_157 = arith.constant 0 : index
    %228 = vector.load %arg7[%c96_156, %c0_157] : memref<512x128xf32, #tpu.memory_space<vmem>>, vector<32x128xf32>
    tpu.vector_store %arg7[%c96_156, %c0_157], %224 {strides = array<i32>} : memref<512x128xf32, #tpu.memory_space<vmem>>, vector<32x128xf32>,
    %c0_158 = arith.constant 0 : index
    %c0_159 = arith.constant 0 : index
    %229 = vector.load %arg7[%c0_158, %c0_159] : memref<512x128xf32, #tpu.memory_space<vmem>>, vector<128x128xf32>
    %c7 = arith.constant 7 : index
    %c0_160 = arith.constant 0 : index
    %c0_161 = arith.constant 0 : index
    %230 = vector.load %arg2[%c7, %c0_160, %c0_161] : memref<8x128x128xf32, #tpu.memory_space<vmem>>, vector<1x128x128xf32>
    %231 = vector.shape_cast %230 : vector<1x128x128xf32> to vector<128x128xf32>
    %cst_162 = arith.constant dense<0.000000e+00> : vector<128x128xf32>
    %232 = tpu.matmul %229, %231, %cst_162 {dimension_numbers = #tpu.dot_dimension_numbers<[1], [0], [0], [1], [0, 0, 1, 1], [], []>} : vector<128x128xf32>, vector<128x128xf32>, vector<128x128xf32> -> vector<128x128xf32>
    %c0_163 = arith.constant 0 : index
    %c0_164 = arith.constant 0 : index
    %233 = vector.load %arg5[%c0_163, %c0_164] : memref<1x128xf32, #tpu.memory_space<vmem>>, vector<1x128xf32>
    %234 = vector.broadcast %233 : vector<1x128xf32> to vector<128x128xf32>
    %235 = arith.addf %232, %234 : vector<128x128xf32>
    %c0_165 = arith.constant 0 : index
    %c0_166 = arith.constant 0 : index
    %236 = vector.load %arg7[%c0_165, %c0_166] : memref<512x128xf32, #tpu.memory_space<vmem>>, vector<128x128xf32>
    tpu.vector_store %arg7[%c0_165, %c0_166], %235 {strides = array<i32>} : memref<512x128xf32, #tpu.memory_space<vmem>>, vector<128x128xf32>,
    %c128_167 = arith.constant 128 : index
    %c0_168 = arith.constant 0 : index
    %237 = vector.load %arg7[%c128_167, %c0_168] : memref<512x128xf32, #tpu.memory_space<vmem>>, vector<128x128xf32>
    tpu.vector_store %arg7[%c128_167, %c0_168], %235 {strides = array<i32>} : memref<512x128xf32, #tpu.memory_space<vmem>>, vector<128x128xf32>,
    %c256_169 = arith.constant 256 : index
    %c0_170 = arith.constant 0 : index
    %238 = vector.load %arg7[%c256_169, %c0_170] : memref<512x128xf32, #tpu.memory_space<vmem>>, vector<128x128xf32>
    tpu.vector_store %arg7[%c256_169, %c0_170], %235 {strides = array<i32>} : memref<512x128xf32, #tpu.memory_space<vmem>>, vector<128x128xf32>,
    %c384_171 = arith.constant 384 : index
    %c0_172 = arith.constant 0 : index
    %239 = vector.load %arg7[%c384_171, %c0_172] : memref<512x128xf32, #tpu.memory_space<vmem>>, vector<128x128xf32>
    tpu.vector_store %arg7[%c384_171, %c0_172], %235 {strides = array<i32>} : memref<512x128xf32, #tpu.memory_space<vmem>>, vector<128x128xf32>,
    %c0_173 = arith.constant 0 : index
    %c0_174 = arith.constant 0 : index
    %240 = vector.load %arg7[%c0_173, %c0_174] : memref<512x128xf32, #tpu.memory_space<vmem>>, vector<512x128xf32>
    %c0_175 = arith.constant 0 : index
    %c0_176 = arith.constant 0 : index
    %241 = vector.load %arg6[%c0_175, %c0_176] : memref<512x128xf32, #tpu.memory_space<vmem>>, vector<512x128xf32>
    tpu.vector_store %arg6[%c0_175, %c0_176], %240 {strides = array<i32>} : memref<512x128xf32, #tpu.memory_space<vmem>>, vector<512x128xf32>,
    return
  }
  func.func @transform_0(%arg0: i32) -> (i32, i32) {
    %c0_i32 = arith.constant 0 : i32
    %c0_i32_0 = arith.constant 0 : i32
    %c0_i32_1 = arith.constant 0 : i32
    return %c0_i32, %c0_i32_0 : i32, i32
  }
  func.func @transform_1(%arg0: i32) -> (i32, i32, i32) {
    %c0_i32 = arith.constant 0 : i32
    %c0_i32_0 = arith.constant 0 : i32
    %c0_i32_1 = arith.constant 0 : i32
    %c0_i32_2 = arith.constant 0 : i32
    return %c0_i32, %c0_i32_0, %c0_i32_1 : i32, i32, i32
  }
  func.func @transform_2(%arg0: i32) -> (i32, i32, i32) {
    %c0_i32 = arith.constant 0 : i32
    %c0_i32_0 = arith.constant 0 : i32
    %c0_i32_1 = arith.constant 0 : i32
    %c0_i32_2 = arith.constant 0 : i32
    return %c0_i32, %c0_i32_0, %c0_i32_1 : i32, i32, i32
  }
  func.func @transform_3(%arg0: i32) -> (i32, i32, i32) {
    %c0_i32 = arith.constant 0 : i32
    %c0_i32_0 = arith.constant 0 : i32
    %c0_i32_1 = arith.constant 0 : i32
    %c0_i32_2 = arith.constant 0 : i32
    return %c0_i32, %c0_i32_0, %c0_i32_1 : i32, i32, i32
  }
  func.func @transform_4(%arg0: i32) -> (i32, i32) {
    %c0_i32 = arith.constant 0 : i32
    %c0_i32_0 = arith.constant 0 : i32
    %c0_i32_1 = arith.constant 0 : i32
    return %c0_i32, %c0_i32_0 : i32, i32
  }
  func.func @transform_5(%arg0: i32) -> (i32, i32) {
    %c0_i32 = arith.constant 0 : i32
    %c0_i32_0 = arith.constant 0 : i32
    %c0_i32_1 = arith.constant 0 : i32
    return %c0_i32, %c0_i32_0 : i32, i32
  }
}

</mosaic_0001>

<bundles_post_ra>
// kernel: autoencoder_forward.1
= control target key start
LH: loop header
LB: loop body
LE: loop exit
PB: predicated region body
PF: predicated region fallthrough
CT: control target
= control target key end

     0   :  { %vm960_vm12 = vcmask 1041408   ;;  %s2859_s1 = inlined_call_operand.vmem [shape: f32[8,128,128], index: 1, kind: input, shape index: {}]   ;;  %s2860_s0 = inlined_call_operand.vmem [shape: f32[512,128], index: 0, kind: input, shape index: {}]   ;;  %s2861_s3 = inlined_call_operand.vmem [shape: f32[8,1,128], index: 3, kind: input, shape index: {}]   ;;  %s2862_s2 = inlined_call_operand.vmem [shape: f32[8,1,128], index: 2, kind: input, shape index: {}]   ;;  %s2863_s4 = inlined_call_operand.vmem [shape: f32[1,128], index: 4, kind: input, shape index: {}]   ;;  %s2864_s5 = inlined_call_operand.vmem [shape: f32[512,128], index: 5, kind: output, shape index: {}]  }
   0x1   :  { %v99_v0 = vld [vmem:[%s2859_s1 + $0x78] sm:$0xff]  ;;  %v98_v1 = vld [vmem:[%s2859_s1 + $0x70] sm:$0xff]  ;;  %v97_v2 = vld [vmem:[%s2859_s1 + $0x68] sm:$0xff] }
   0x2   :  { %100 = vmatpush.msra.mxu0 %v99_v0  ;;  %1722 = vmatpush.msra.mxu2 %v99_v0  ;;  %v96_v3 = vld [vmem:[%s2859_s1 + $0x60] sm:$0xff]  ;;  %v95_v4 = vld [vmem:[%s2859_s1 + $0x58] sm:$0xff]  ;;  %v94_v5 = vld [vmem:[%s2859_s1 + $0x50] sm:$0xff] }
   0x3   :  { %1723 = vmatpush.msra.mxu3 %v99_v0  ;;  %1721 = vmatpush.msra.mxu1 %v99_v0  ;;  %v93_v6 = vld [vmem:[%s2859_s1 + $0x48] sm:$0xff]  ;;  %v92_v7 = vld [vmem:[%s2859_s1 + $0x40] sm:$0xff]  ;;  %v91_v8 = vld [vmem:[%s2859_s1 + $0x38] sm:$0xff] }
   0x4   :  { %101 = vmatpush.msra.mxu0 %v98_v1  ;;  %1725 = vmatpush.msra.mxu2 %v98_v1  ;;  %v90_v9 = vld [vmem:[%s2859_s1 + $0x30] sm:$0xff]  ;;  %v89_v10 = vld [vmem:[%s2859_s1 + $0x28] sm:$0xff]  ;;  %v88_v11 = vld [vmem:[%s2859_s1 + $0x20] sm:$0xff] }
   0x5   :  { %1726 = vmatpush.msra.mxu3 %v98_v1  ;;  %1724 = vmatpush.msra.mxu1 %v98_v1  ;;  %v87_v12 = vld [vmem:[%s2859_s1 + $0x18] sm:$0xff]  ;;  %v86_v13 = vld [vmem:[%s2859_s1 + $0x10] sm:$0xff]  ;;  %v85_v14 = vld [vmem:[%s2859_s1 + $0x8] sm:$0xff] }
   0x6   :  { %102 = vmatpush.msra.mxu0 %v97_v2  ;;  %1728 = vmatpush.msra.mxu2 %v97_v2  ;;  %v84_v15 = vld [vmem:[%s2859_s1] sm:$0xff]  ;;  %v62_v17 = vld [vmem:[%s2860_s0 + $0x150] sm:$0xff]  ;;  %v21_v18 = vld [vmem:[%s2860_s0 + $0x8] sm:$0xff] }
   0x7   :  { %1729 = vmatpush.msra.mxu3 %v97_v2  ;;  %1727 = vmatpush.msra.mxu1 %v97_v2  ;;  %v20_v16 = vld [vmem:[%s2860_s0] sm:$0xff]  ;;  %v63_v19 = vld [vmem:[%s2860_s0 + $0x158] sm:$0xff]  ;;  %v22_v20 = vld [vmem:[%s2860_s0 + $0x10] sm:$0xff] }
   0x8   :  { %103 = vmatpush.msra.mxu0 %v96_v3  ;;  %1731 = vmatpush.msra.mxu2 %v96_v3  ;;  %v64_v21 = vld [vmem:[%s2860_s0 + $0x160] sm:$0xff]  ;;  %v23_v22 = vld [vmem:[%s2860_s0 + $0x18] sm:$0xff]  ;;  %v65_v23 = vld [vmem:[%s2860_s0 + $0x168] sm:$0xff] }
   0x9   :  { %1732 = vmatpush.msra.mxu3 %v96_v3  ;;  %1730 = vmatpush.msra.mxu1 %v96_v3  ;;  %v24_v24 = vld [vmem:[%s2860_s0 + $0x20] sm:$0xff]  ;;  %v66_v25 = vld [vmem:[%s2860_s0 + $0x170] sm:$0xff]  ;;  %v25_v26 = vld [vmem:[%s2860_s0 + $0x28] sm:$0xff] }
   0xa   :  { %104 = vmatpush.msra.mxu0 %v95_v4  ;;  %1734 = vmatpush.msra.mxu2 %v95_v4  ;;  %v67_v27 = vld [vmem:[%s2860_s0 + $0x178] sm:$0xff]  ;;  %v26_v28 = vld [vmem:[%s2860_s0 + $0x30] sm:$0xff]  ;;  %v68_v29 = vld [vmem:[%s2860_s0 + $0x180] sm:$0xff] }
   0xb   :  { %1735 = vmatpush.msra.mxu3 %v95_v4  ;;  %1733 = vmatpush.msra.mxu1 %v95_v4  ;;  %v79_v30 = vld [vmem:[%s2860_s0 + $0x1d8] sm:$0xff]  ;;  %v69_v32 = vld [vmem:[%s2860_s0 + $0x188] sm:$0xff]  ;;  %v80_v33 = vld [vmem:[%s2860_s0 + $0x1e0] sm:$0xff] }
   0xc   :  { %105 = vmatpush.msra.mxu0 %v94_v5  ;;  %1737 = vmatpush.msra.mxu2 %v94_v5  ;;  %v27_v31 = vld [vmem:[%s2860_s0 + $0x38] sm:$0xff]  ;;  %v28_v34 = vld [vmem:[%s2860_s0 + $0x40] sm:$0xff]  ;;  %v70_v35 = vld [vmem:[%s2860_s0 + $0x190] sm:$0xff] }
   0xd   :  { %1738 = vmatpush.msra.mxu3 %v94_v5  ;;  %1736 = vmatpush.msra.mxu1 %v94_v5  ;;  %v81_v36 = vld [vmem:[%s2860_s0 + $0x1e8] sm:$0xff]  ;;  %v71_v38 = vld [vmem:[%s2860_s0 + $0x198] sm:$0xff]  ;;  %v82_v40 = vld [vmem:[%s2860_s0 + $0x1f0] sm:$0xff] }
   0xe   :  { %106 = vmatpush.msra.mxu0 %v93_v6  ;;  %1740 = vmatpush.msra.mxu2 %v93_v6  ;;  %v29_v37 = vld [vmem:[%s2860_s0 + $0x48] sm:$0xff]  ;;  %v30_v41 = vld [vmem:[%s2860_s0 + $0x50] sm:$0xff]  ;;  %v72_v42 = vld [vmem:[%s2860_s0 + $0x1a0] sm:$0xff] }
   0xf   :  { %1741 = vmatpush.msra.mxu3 %v93_v6  ;;  %1739 = vmatpush.msra.mxu1 %v93_v6  ;;  %v49_v39 = vld [vmem:[%s2860_s0 + $0xe8] sm:$0xff]  ;;  %v50_v43 = vld [vmem:[%s2860_s0 + $0xf0] sm:$0xff]  ;;  %v83_v44 = vld [vmem:[%s2860_s0 + $0x1f8] sm:$0xff] }
  0x10   :  { %107 = vmatpush.msra.mxu0 %v92_v7  ;;  %1743 = vmatpush.msra.mxu2 %v92_v7  ;;  %v31_v45 = vld [vmem:[%s2860_s0 + $0x58] sm:$0xff]  ;;  %v73_v46 = vld [vmem:[%s2860_s0 + $0x1a8] sm:$0xff]  ;;  %v32_v48 = vld [vmem:[%s2860_s0 + $0x60] sm:$0xff] }
  0x11   :  { %1744 = vmatpush.msra.mxu3 %v92_v7  ;;  %1742 = vmatpush.msra.mxu1 %v92_v7  ;;  %v51_v47 = vld [vmem:[%s2860_s0 + $0xf8] sm:$0xff]  ;;  %v74_v49 = vld [vmem:[%s2860_s0 + $0x1b0] sm:$0xff]  ;;  %v52_v50 = vld [vmem:[%s2860_s0 + $0x100] sm:$0xff] }
  0x12   :  { %108 = vmatpush.msra.mxu0 %v91_v8  ;;  %1746 = vmatpush.msra.mxu2 %v91_v8  ;;  %v33_v51 = vld [vmem:[%s2860_s0 + $0x68] sm:$0xff]  ;;  %v75_v52 = vld [vmem:[%s2860_s0 + $0x1b8] sm:$0xff]  ;;  %v34_v54 = vld [vmem:[%s2860_s0 + $0x70] sm:$0xff] }
  0x13   :  { %1747 = vmatpush.msra.mxu3 %v91_v8  ;;  %1745 = vmatpush.msra.mxu1 %v91_v8  ;;  %v53_v53 = vld [vmem:[%s2860_s0 + $0x108] sm:$0xff]  ;;  %v76_v55 = vld [vmem:[%s2860_s0 + $0x1c0] sm:$0xff]  ;;  %v54_v56 = vld [vmem:[%s2860_s0 + $0x110] sm:$0xff] }
  0x14   :  { %109 = vmatpush.msra.mxu0 %v90_v9  ;;  %1749 = vmatpush.msra.mxu2 %v90_v9  ;;  %v35_v57 = vld [vmem:[%s2860_s0 + $0x78] sm:$0xff]  ;;  %v77_v58 = vld [vmem:[%s2860_s0 + $0x1c8] sm:$0xff]  ;;  %v36_v61 = vld [vmem:[%s2860_s0 + $0x80] sm:$0xff] }
  0x15   :  { %1750 = vmatpush.msra.mxu3 %v90_v9  ;;  %1748 = vmatpush.msra.mxu1 %v90_v9  ;;  %v55_v59 = vld [vmem:[%s2860_s0 + $0x118] sm:$0xff]  ;;  %v78_v62 = vld [vmem:[%s2860_s0 + $0x1d0] sm:$0xff]  ;;  %v56_v63 = vld [vmem:[%s2860_s0 + $0x120] sm:$0xff] }
  0x16   :  { %110 = vmatpush.msra.mxu0 %v89_v10  ;;  %1752 = vmatpush.msra.mxu2 %v89_v10  ;;  %v37_v1 = vld [vmem:[%s2860_s0 + $0x88] sm:$0xff]  ;;  %v38_v4 = vld [vmem:[%s2860_s0 + $0x90] sm:$0xff]  ;;  %v39_v7 = vld [vmem:[%s2860_s0 + $0x98] sm:$0xff] }
  0x17   :  { %1753 = vmatpush.msra.mxu3 %v89_v10  ;;  %1751 = vmatpush.msra.mxu1 %v89_v10  ;;  %v57_v2 = vld [vmem:[%s2860_s0 + $0x128] sm:$0xff]  ;;  %v58_v5 = vld [vmem:[%s2860_s0 + $0x130] sm:$0xff]  ;;  %v59_v8 = vld [vmem:[%s2860_s0 + $0x138] sm:$0xff] }
  0x18   :  { %111 = vmatpush.msra.mxu0 %v88_v11  ;;  %1755 = vmatpush.msra.mxu2 %v88_v11  ;;  %v40_v10 = vld [vmem:[%s2860_s0 + $0xa0] sm:$0xff] }
  0x19   :  { %1756 = vmatpush.msra.mxu3 %v88_v11  ;;  %1754 = vmatpush.msra.mxu1 %v88_v11  ;;  %v60_v11 = vld [vmem:[%s2860_s0 + $0x140] sm:$0xff] }
  0x1a   :  { %112 = vmatpush.msra.mxu0 %v87_v12  ;;  %1758 = vmatpush.msra.mxu2 %v87_v12 }
  0x1b   :  { %1759 = vmatpush.msra.mxu3 %v87_v12  ;;  %1757 = vmatpush.msra.mxu1 %v87_v12 }
  0x1c   :  { %113 = vmatpush.msra.mxu0 %v86_v13  ;;  %1761 = vmatpush.msra.mxu2 %v86_v13 }
  0x1d   :  { %1762 = vmatpush.msra.mxu3 %v86_v13  ;;  %1760 = vmatpush.msra.mxu1 %v86_v13  ;;  %v41_v13 = vld [vmem:[%s2860_s0 + $0xa8] sm:$0xff] }
  0x1e   :  { %114 = vmatpush.msra.mxu0 %v85_v14  ;;  %1764 = vmatpush.msra.mxu2 %v85_v14 }
  0x1f   :  { %1765 = vmatpush.msra.mxu3 %v85_v14  ;;  %1763 = vmatpush.msra.mxu1 %v85_v14  ;;  %v61_v14 = vld [vmem:[%s2860_s0 + $0x148] sm:$0xff] }
  0x20   :  { %115 = vmatpush.msra.mxu0 %v84_v15  ;;  %1767 = vmatpush.msra.mxu2 %v84_v15 }
  0x21   :  { %116 = vmatmul.f32.vlgmr.msra.gmra.mxu0 %v20_v16  ;;  %242 = vmatmul.f32.vlgmr.msra.gmra.mxu2 %v62_v17  ;;  %v42_v16 = vld [vmem:[%s2860_s0 + $0xb0] sm:$0xff] }
  0x22   :  { %1768 = vmatpush.msra.mxu3 %v84_v15  ;;  %1766 = vmatpush.msra.mxu1 %v84_v15 }
  0x23   :  { %293 = vmatmul.f32.vlgmr.msra.gmra.mxu3 %v79_v30  ;;  %203 = vmatmul.f32.vlgmr.msra.gmra.mxu1 %v49_v39 }
  0x29   :  { %119 = vmatmul.f32.gmra.mxu0 %v21_v18  ;;  %245 = vmatmul.f32.gmra.mxu2 %v63_v19  ;;  %v43_v19 = vld [vmem:[%s2860_s0 + $0xb8] sm:$0xff] }
  0x2b   :  { %296 = vmatmul.f32.gmra.mxu3 %v80_v33  ;;  %206 = vmatmul.f32.gmra.mxu1 %v50_v43 }
  0x31   :  { %122 = vmatmul.f32.gmra.mxu0 %v22_v20  ;;  %248 = vmatmul.f32.gmra.mxu2 %v64_v21  ;;  %v44_v21 = vld [vmem:[%s2860_s0 + $0xc0] sm:$0xff] }
  0x33   :  { %299 = vmatmul.f32.gmra.mxu3 %v81_v36  ;;  %209 = vmatmul.f32.gmra.mxu1 %v51_v47  ;;  %v48_v36 = vld [vmem:[%s2860_s0 + $0xe0] sm:$0xff] }
  0x39   :  { %125 = vmatmul.f32.gmra.mxu0 %v23_v22  ;;  %251 = vmatmul.f32.gmra.mxu2 %v65_v23 }
  0x3b   :  { %302 = vmatmul.f32.gmra.mxu3 %v82_v40  ;;  %212 = vmatmul.f32.gmra.mxu1 %v52_v50 }
  0x41   :  { %128 = vmatmul.f32.gmra.mxu0 %v24_v24  ;;  %254 = vmatmul.f32.gmra.mxu2 %v66_v25  ;;  %v45_v24 = vld [vmem:[%s2860_s0 + $0xc8] sm:$0xff] }
  0x43   :  { %305 = vmatmul.f32.gmra.mxu3 %v83_v44  ;;  %215 = vmatmul.f32.gmra.mxu1 %v53_v53 }
  0x49   :  { %131 = vmatmul.f32.gmra.mxu0 %v25_v26  ;;  %257 = vmatmul.f32.gmra.mxu2 %v67_v27 }
  0x4b   :  { %218 = vmatmul.f32.gmra.mxu1 %v54_v56 }
  0x51   :  { %134 = vmatmul.f32.gmra.mxu0 %v26_v28  ;;  %260 = vmatmul.f32.gmra.mxu2 %v68_v29  ;;  %v46_v28 = vld [vmem:[%s2860_s0 + $0xd0] sm:$0xff] }
  0x53   :  { %221 = vmatmul.f32.gmra.mxu1 %v55_v59 }
  0x59   :  { %137 = vmatmul.f32.gmra.mxu0 %v27_v31  ;;  %263 = vmatmul.f32.gmra.mxu2 %v69_v32  ;;  %v47_v32 = vld [vmem:[%s2860_s0 + $0xd8] sm:$0xff] }
  0x5b   :  { %224 = vmatmul.f32.gmra.mxu1 %v56_v63 }
  0x61   :  { %140 = vmatmul.f32.gmra.mxu0 %v28_v34  ;;  %266 = vmatmul.f32.gmra.mxu2 %v70_v35 }
  0x63   :  { %227 = vmatmul.f32.gmra.mxu1 %v57_v2 }
  0x69   :  { %143 = vmatmul.f32.gmra.mxu0 %v29_v37  ;;  %269 = vmatmul.f32.gmra.mxu2 %v71_v38 }
  0x6b   :  { %230 = vmatmul.f32.gmra.mxu1 %v58_v5 }
  0x71   :  { %146 = vmatmul.f32.gmra.mxu0 %v30_v41  ;;  %272 = vmatmul.f32.gmra.mxu2 %v72_v42 }
  0x73   :  { %233 = vmatmul.f32.gmra.mxu1 %v59_v8 }
  0x79   :  { %149 = vmatmul.f32.gmra.mxu0 %v31_v45  ;;  %275 = vmatmul.f32.gmra.mxu2 %v73_v46 }
  0x7b   :  { %236 = vmatmul.f32.gmra.mxu1 %v60_v11 }
  0x81   :  { %152 = vmatmul.f32.gmra.mxu0 %v32_v48  ;;  %278 = vmatmul.f32.gmra.mxu2 %v74_v49 }
  0x83   :  { %239 = vmatmul.f32.gmra.mxu1 %v61_v14 }
  0x89   :  { %155 = vmatmul.f32.gmra.mxu0 %v33_v51  ;;  %281 = vmatmul.f32.gmra.mxu2 %v75_v52 }
  0x91   :  { %158 = vmatmul.f32.gmra.mxu0 %v34_v54  ;;  %284 = vmatmul.f32.gmra.mxu2 %v76_v55 }
  0x99   :  { %161 = vmatmul.f32.gmra.mxu0 %v35_v57  ;;  %287 = vmatmul.f32.gmra.mxu2 %v77_v58 }
  0x9e   :  { %v2017_v60 = vpop.f32.mrf.mxu0 }
  0xa0   :  { %v204_v33 = vpop.f32.mrf.mxu1 }
  0xa1   :  { %164 = vmatmul.f32.gmra.mxu0 %v36_v61  ;;  %290 = vmatmul.f32.gmra.mxu2 %v78_v62 }
  0xa4   :  { %v2073_v17 = vpop.f32.mrf.mxu2 }
  0xa6   :  { %v2028_v0 = vpop.f32.mrf.mxu0  ;;  %v2094_v26 = vpop.f32.mrf.mxu3 }
  0xa8   :  { %v207_v38 = vpop.f32.mrf.mxu1 }
  0xa9   :  { %167 = vmatmul.f32.gmra.mxu0 %v37_v1 }
  0xac   :  { %v2085_v22 = vpop.f32.mrf.mxu2 }
  0xae   :  { %v2036_v3 = vpop.f32.mrf.mxu0  ;;  %v2101_v30 = vpop.f32.mrf.mxu3 }
  0xb0   :  { %v210_v47 = vpop.f32.mrf.mxu1 }
  0xb1   :  { %170 = vmatmul.f32.gmra.mxu0 %v38_v4 }
  0xb4   :  { %v2092_v25 = vpop.f32.mrf.mxu2 }
  0xb6   :  { %v2044_v6 = vpop.f32.mrf.mxu0  ;;  %v300_v37 = vpop.f32.mrf.mxu3 }
  0xb8   :  { %v213_v55 = vpop.f32.mrf.mxu1 }
  0xb9   :  { %173 = vmatmul.f32.gmra.mxu0 %v39_v7 }
  0xbc   :  { %v252_v29 = vpop.f32.mrf.mxu2 }
  0xbd   :  { %v466_v39 = vmax.f32 %v252_v29, %v300_v37 }
  0xbe   :  { %v2052_v9 = vpop.f32.mrf.mxu0  ;;  %v303_v43 = vpop.f32.mrf.mxu3 }
  0xc0   :  { %v216_v59 = vpop.f32.mrf.mxu1 }
  0xc1   :  { %176 = vmatmul.f32.gmra.mxu0 %v40_v10 }
  0xc4   :  { %v255_v34 = vpop.f32.mrf.mxu2 }
  0xc5   :  { %v467_v45 = vmax.f32 %v255_v34, %v303_v43  ;;  %v1609_v43 = vld [vmem:[%s2859_s1 + $0xe0] sm:$0xff] }
  0xc6   :  { %v2060_v12 = vpop.f32.mrf.mxu0  ;;  %v306_v51 = vpop.f32.mrf.mxu3 }
  0xc8   :  { %v219_v10 = vpop.f32.mrf.mxu1 }
  0xc9   :  { %179 = vmatmul.f32.gmra.mxu0 %v41_v13 }
  0xcc   :  { %v258_v42 = vpop.f32.mrf.mxu2 }
  0xcd   :  { %v468_v52 = vmax.f32 %v258_v42, %v306_v51  ;;  %v1610_v42 = vld [vmem:[%s2859_s1 + $0xe8] sm:$0xff]  ;;  %v1607_v51 = vld [vmem:[%s2859_s1 + $0xd0] sm:$0xff] }
  0xce   :  { %v2068_v15 = vpop.f32.mrf.mxu0 }
  0xd1   :  { %182 = vmatmul.f32.gmra.mxu0 %v42_v16  ;;  %v222_v16 = vpop.f32.mrf.mxu1 }
  0xd4   :  { %v261_v50 = vpop.f32.mrf.mxu2 }
  0xd5   :  { %v453_v62 = vmax.f32 %v213_v55, %v261_v50 }
  0xd6   :  { %v2075_v18 = vpop.f32.mrf.mxu0 }
  0xd9   :  { %185 = vmatmul.f32.gmra.mxu0 %v43_v19 }
  0xdc   :  { %v264_v57 = vpop.f32.mrf.mxu2 }
  0xdd   :  { %v454_v63 = vmax.f32 %v216_v59, %v264_v57  ;;  %v1605_v59 = vld [vmem:[%s2859_s1 + $0xc0] sm:$0xff] }
  0xde   :  { %v2080_v20 = vpop.f32.mrf.mxu0 }
  0xe1   :  { %188 = vmatmul.f32.gmra.mxu0 %v44_v21  ;;  %v225_v21 = vpop.f32.mrf.mxu1 }
  0xe4   :  { %v267_v1 = vpop.f32.mrf.mxu2 }
  0xe6   :  { %v2087_v23 = vpop.f32.mrf.mxu0 }
  0xe9   :  { %191 = vmatmul.f32.gmra.mxu0 %v45_v24  ;;  %v228_v29 = vpop.f32.mrf.mxu1 }
  0xec   :  { %v270_v13 = vpop.f32.mrf.mxu2 }
  0xee   :  { %v2096_v27 = vpop.f32.mrf.mxu0 }
  0xf1   :  { %194 = vmatmul.f32.gmra.mxu0 %v46_v28 }
  0xf4   :  { %v273_v19 = vpop.f32.mrf.mxu2 }
  0xf5   :  { %v457_v57 = vmax.f32 %v225_v21, %v273_v19 }
  0xf6   :  { %v2103_v31 = vpop.f32.mrf.mxu0 }
  0xf9   :  { %197 = vmatmul.f32.gmra.mxu0 %v47_v32 }
  0xfc   :  { %v276_v24 = vpop.f32.mrf.mxu2 }
  0xfe   :  { %v2108_v35 = vpop.f32.mrf.mxu0 }
 0x101   :  { %200 = vmatmul.f32.gmra.mxu0 %v48_v36 }
 0x104   :  { %v279_v32 = vpop.f32.mrf.mxu2 }
 0x106   :  { %v156_v40 = vpop.f32.mrf.mxu0 }
 0x107   :  { %v418_v41 = vmax.f32 %v156_v40, %v204_v33  ;;  %v231_v33 = vpop.f32.mrf.mxu1  ;;  %v1611_v40 = vld [vmem:[%s2859_s1 + $0xf0] sm:$0xff] }
 0x109   :  { %v2113_v44 = vmax.f32 %v418_v41, %v466_v39  ;;  %v1612_v39 = vld [vmem:[%s2859_s1 + $0xf8] sm:$0xff] }
 0x10a   :  { %637 = vmatpush.msrb.mxu1 %v1612_v39 }
 0x10c   :  { %v282_v36 = vpop.f32.mrf.mxu2  ;;  %638 = vmatpush.msrb.mxu1 %v1611_v40  ;;  %v1599_v40 = vld [vmem:[%s2859_s1 + $0x90] sm:$0xff] }
 0x10e   :  { %v159_v46 = vpop.f32.mrf.mxu0  ;;  %639 = vmatpush.msrb.mxu1 %v1610_v42  ;;  %v464_v42 = vmax.f32 %v2085_v22, %v2094_v26  ;;  %v465_v22 = vmax.f32 %v2092_v25, %v2101_v30 }
 0x10f   :  { %v419_v48 = vmax.f32 %v159_v46, %v207_v38  ;;  %v234_v37 = vpop.f32.mrf.mxu1  ;;  %v1608_v46 = vld [vmem:[%s2859_s1 + $0xd8] sm:$0xff] }
 0x110   :  { %640 = vmatpush.msrb.mxu1 %v1609_v43  ;;  %v1598_v43 = vld [vmem:[%s2859_s1 + $0x88] sm:$0xff] }
 0x111   :  { %v2115_v49 = vmax.f32 %v419_v48, %v467_v45  ;;  %v455_v48 = vmax.f32 %v219_v10, %v267_v1 }
 0x112   :  { %641 = vmatpush.msrb.mxu1 %v1608_v46  ;;  %v1597_v46 = vld [vmem:[%s2859_s1 + $0x80] sm:$0xff] }
 0x114   :  { %v285_v41 = vpop.f32.mrf.mxu2  ;;  %642 = vmatpush.msrb.mxu1 %v1607_v51 }
 0x116   :  { %v162_v53 = vpop.f32.mrf.mxu0 }
 0x117   :  { %v420_v54 = vmax.f32 %v162_v53, %v210_v47  ;;  %v237_v50 = vpop.f32.mrf.mxu1  ;;  %v456_v53 = vmax.f32 %v222_v16, %v270_v13  ;;  %v460_v13 = vmax.f32 %v234_v37, %v282_v36  ;;  %v1600_v36 = vld [vmem:[%s2859_s1 + $0x98] sm:$0xff] }
 0x119   :  { %v2117_v56 = vmax.f32 %v420_v54, %v468_v52  ;;  %v1606_v54 = vld [vmem:[%s2859_s1 + $0xc8] sm:$0xff] }
 0x11a   :  { %643 = vmatpush.msrb.mxu1 %v1606_v54 }
 0x11c   :  { %644 = vmatpush.msrb.mxu1 %v1605_v59 }
 0x11e   :  { %v165_v58 = vpop.f32.mrf.mxu0 }
 0x11f   :  { %v405_v61 = vmax.f32 %v2017_v60, %v165_v58  ;;  %v240_v19 = vpop.f32.mrf.mxu1 }
 0x121   :  { %v2121_v5 = vmax.f32 %v405_v61, %v453_v62 }
 0x126   :  { %v168_v2 = vpop.f32.mrf.mxu0 }
 0x127   :  { %v406_v4 = vmax.f32 %v2028_v0, %v168_v2  ;;  %v459_v2 = vmax.f32 %v231_v33, %v279_v32 }
 0x129   :  { %v2123_v7 = vmax.f32 %v406_v4, %v454_v63 }
 0x12b   :  { %v485_v8 = vadd.f32 %v2123_v7, %v2121_v5 }
 0x12e   :  { %v171_v11 = vpop.f32.mrf.mxu0 }
 0x12f   :  { %v407_v47 = vmax.f32 %v2036_v3, %v171_v11  ;;  %v288_v3 = vpop.f32.mrf.mxu2 }
 0x131   :  { %v2151_v58 = vmax.f32 %v407_v47, %v455_v48 }
 0x133   :  { %v486_v10 = vadd.f32 %v485_v8, %v2151_v58 }
 0x136   :  { %v174_v14 = vpop.f32.mrf.mxu0 }
 0x137   :  { %v408_v52 = vmax.f32 %v2044_v6, %v174_v14  ;;  %v458_v6 = vmax.f32 %v228_v29, %v276_v24  ;;  %v462_v29 = vmax.f32 %v240_v19, %v288_v3  ;;  %v291_v33 = vpop.f32.mrf.mxu2 }
 0x139   :  { %v2157_v62 = vmax.f32 %v408_v52, %v456_v53 }
 0x13b   :  { %v487_v16 = vadd.f32 %v486_v10, %v2157_v62 }
 0x13e   :  { %v177_v60 = vpop.f32.mrf.mxu0 }
 0x13f   :  { %v409_v55 = vmax.f32 %v2052_v9, %v177_v60  ;;  %v1604_v9 = vld [vmem:[%s2859_s1 + $0xb8] sm:$0xff]  ;;  %v461_v60 = vmax.f32 %v237_v50, %v285_v41 }
 0x140   :  { %645 = vmatpush.msrb.mxu1 %v1604_v9 }
 0x141   :  { %v2163_v4 = vmax.f32 %v409_v55, %v457_v57 }
 0x143   :  { %v488_v24 = vadd.f32 %v487_v16, %v2163_v4 }
 0x146   :  { %v180_v28 = vpop.f32.mrf.mxu0 }
 0x147   :  { %v410_v61 = vmax.f32 %v2060_v12, %v180_v28  ;;  %v1603_v12 = vld [vmem:[%s2859_s1 + $0xb0] sm:$0xff] }
 0x148   :  { %646 = vmatpush.msrb.mxu1 %v1603_v12 }
 0x149   :  { %v2170_v14 = vmax.f32 %v410_v61, %v458_v6 }
 0x14e   :  { %v183_v0 = vpop.f32.mrf.mxu0 }
 0x14f   :  { %v411_v1 = vmax.f32 %v2068_v15, %v183_v0  ;;  %v1602_v15 = vld [vmem:[%s2859_s1 + $0xa8] sm:$0xff]  ;;  %v489_v0 = vadd.f32 %v488_v24, %v2170_v14 }
 0x150   :  { %647 = vmatpush.msrb.mxu1 %v1602_v15 }
 0x151   :  { %v2177_v21 = vmax.f32 %v411_v1, %v459_v2 }
 0x156   :  { %v186_v34 = vpop.f32.mrf.mxu0 }
 0x157   :  { %v412_v11 = vmax.f32 %v2075_v18, %v186_v34  ;;  %v1601_v18 = vld [vmem:[%s2859_s1 + $0xa0] sm:$0xff] }
 0x158   :  { %648 = vmatpush.msrb.mxu1 %v1601_v18 }
 0x159   :  { %v2184_v32 = vmax.f32 %v412_v11, %v460_v13 }
 0x15a   :  { %649 = vmatpush.msrb.mxu1 %v1600_v36 }
 0x15c   :  { %650 = vmatpush.msrb.mxu1 %v1599_v40 }
 0x15e   :  { %v189_v38 = vpop.f32.mrf.mxu0  ;;  %651 = vmatpush.msrb.mxu1 %v1598_v43 }
 0x15f   :  { %v413_v8 = vmax.f32 %v2080_v20, %v189_v38  ;;  %v490_v38 = vadd.f32 %v489_v0, %v2177_v21 }
 0x160   :  { %652 = vmatpush.msrb.mxu1 %v1597_v46 }
 0x161   :  { %v2191_v37 = vmax.f32 %v413_v8, %v461_v60 }
 0x166   :  { %v192_v45 = vpop.f32.mrf.mxu0 }
 0x167   :  { %v414_v28 = vmax.f32 %v2087_v23, %v192_v45  ;;  %v463_v23 = vmax.f32 %v2073_v17, %v291_v33 }
 0x169   :  { %v2199_v41 = vmax.f32 %v414_v28, %v462_v29 }
 0x16e   :  { %v195_v63 = vpop.f32.mrf.mxu0 }
 0x16f   :  { %v415_v20 = vmax.f32 %v2096_v27, %v195_v63  ;;  %v491_v27 = vadd.f32 %v490_v38, %v2184_v32 }
 0x171   :  { %v479_v45 = vmax.f32 %v415_v20, %v463_v23  ;;  %v492_v17 = vadd.f32 %v491_v27, %v2191_v37 }
 0x173   :  { %v493_v48 = vadd.f32 %v492_v17, %v2199_v41 }
 0x175   :  { %v494_v51 = vadd.f32 %v493_v48, %v479_v45 }
 0x176   :  { %v198_v34 = vpop.f32.mrf.mxu0 }
 0x177   :  { %v416_v39 = vmax.f32 %v2103_v31, %v198_v34  ;;  %v1803_v31 = vmov 128.0  }
 0x178   :  { %1781 = vrcp.f32 %v1803_v31 }
 0x179   :  { %v480_v47 = vmax.f32 %v416_v39, %v464_v42 }
 0x17b   :  { %v495_v54 = vadd.f32 %v494_v51, %v480_v47 }
 0x17e   :  { %v201_v50 = vpop.f32.mrf.mxu0  ;;  %v1782_v52 = vpop.eup %1781 }
 0x17f   :  { %v417_v26 = vmax.f32 %v2108_v35, %v201_v50  ;;  %v507_v57 = vmul.f32 128.0, %v1782_v52  ;;  %vm511_vm0 = vweird.f32 %v1782_v52 }
 0x181   :  { %v481_v53 = vmax.f32 %v417_v26, %v465_v22  ;;  %v508_v61 = vsub.f32 1.0, %v507_v57 }
 0x183   :  { %v496_v55 = vadd.f32 %v495_v54, %v481_v53  ;;  %v509_v9 = vmul.f32 %v1782_v52, %v508_v61 }
 0x185   :  { %v497_v3 = vadd.f32 %v496_v55, %v2113_v44  ;;  %v510_v30 = vadd.f32 %v1782_v52, %v509_v9 }
 0x187   :  { %v498_v59 = vadd.f32 %v497_v3, %v2115_v49  ;;  %v512_v10 = vsel %vm511_vm0, %v1782_v52, %v510_v30 }
 0x189   :  { %v499_v6 = vadd.f32 %v498_v59, %v2117_v56 }
 0x18b   :  { %v500_v63 = vrot.slane %v499_v6, 4 }
 0x18d   :  { %v501_v1 = vadd.f32 %v500_v63, %v499_v6 }
 0x18f   :  { %v502_v25 = vrot.slane %v501_v1, 2 }
 0x191   :  { %v503_v35 = vadd.f32 %v502_v25, %v501_v1 }
 0x193   :  { %v504_v2 = vrot.slane %v503_v35, 1 }
 0x195   :  { %v505_v12 = vadd.f32 %v504_v2, %v503_v35  ;;  %v568_v2 = vld [vmem:[%s2862_s2] sm:$0x1] }
 0x197   :  { %v513_v11 = vmul.f32 %v512_v10, %v505_v12 }
 0x199   :  { %v2219_v13 = vsub.f32 %v2121_v5, %v513_v11  ;;  %v2222_v16 = vsub.f32 %v2123_v7, %v513_v11  ;;  %v2224_v19 = vsub.f32 %v481_v53, %v513_v11  ;;  %v2227_v15 = vsub.f32 %v2113_v44, %v513_v11 }
 0x19a   :  { %v2230_v8 = vsub.f32 %v2115_v49, %v513_v11  ;;  %v2233_v60 = vsub.f32 %v2117_v56, %v513_v11  ;;  %v2236_v24 = vsub.f32 %v2151_v58, %v513_v11  ;;  %v2243_v18 = vsub.f32 %v2157_v62, %v513_v11 }
 0x19b   :  { %v530_v5 = vmul.f32 %v2219_v13, %v2219_v13  ;;  %v531_v7 = vmul.f32 %v2222_v16, %v2222_v16  ;;  %v2246_v44 = vsub.f32 %v2163_v4, %v513_v11  ;;  %v2251_v28 = vsub.f32 %v2170_v14, %v513_v11 }
 0x19c   :  { %v532_v49 = vmul.f32 %v2236_v24, %v2236_v24  ;;  %v533_v58 = vmul.f32 %v2243_v18, %v2243_v18  ;;  %v2256_v0 = vsub.f32 %v2177_v21, %v513_v11  ;;  %v2261_v4 = vsub.f32 %v2184_v32, %v513_v11 }
 0x19d   :  { %v546_v56 = vadd.f32 %v531_v7, %v530_v5  ;;  %v534_v62 = vmul.f32 %v2246_v44, %v2246_v44  ;;  %v535_v34 = vmul.f32 %v2251_v28, %v2251_v28  ;;  %v522_v14 = vsub.f32 %v2191_v37, %v513_v11 }
 0x19e   :  { %v536_v36 = vmul.f32 %v2256_v0, %v2256_v0  ;;  %v523_v21 = vsub.f32 %v2199_v41, %v513_v11  ;;  %v537_v23 = vmul.f32 %v2261_v4, %v2261_v4  ;;  %v524_v40 = vsub.f32 %v479_v45, %v513_v11 }
 0x19f   :  { %v547_v29 = vadd.f32 %v546_v56, %v532_v49  ;;  %v538_v27 = vmul.f32 %v522_v14, %v522_v14  ;;  %v525_v42 = vsub.f32 %v480_v47, %v513_v11  ;;  %v542_v50 = vmul.f32 %v2224_v19, %v2224_v19 }
 0x1a0   :  { %v539_v43 = vmul.f32 %v523_v21, %v523_v21  ;;  %v540_v31 = vmul.f32 %v524_v40, %v524_v40  ;;  %v543_v41 = vmul.f32 %v2227_v15, %v2227_v15  ;;  %v544_v45 = vmul.f32 %v2230_v8, %v2230_v8 }
 0x1a1   :  { %v548_v33 = vadd.f32 %v547_v29, %v533_v58  ;;  %v541_v48 = vmul.f32 %v525_v42, %v525_v42  ;;  %v545_v47 = vmul.f32 %v2233_v60, %v2233_v60 }
 0x1a3   :  { %v549_v20 = vadd.f32 %v548_v33, %v534_v62 }
 0x1a5   :  { %v550_v38 = vadd.f32 %v549_v20, %v535_v34 }
 0x1a7   :  { %v551_v39 = vadd.f32 %v550_v38, %v536_v36 }
 0x1a9   :  { %v552_v32 = vadd.f32 %v551_v39, %v537_v23 }
 0x1ab   :  { %v553_v17 = vadd.f32 %v552_v32, %v538_v27 }
 0x1ad   :  { %v554_v46 = vadd.f32 %v553_v17, %v539_v43 }
 0x1af   :  { %v555_v37 = vadd.f32 %v554_v46, %v540_v31 }
 0x1b1   :  { %v556_v22 = vadd.f32 %v555_v37, %v541_v48 }
 0x1b3   :  { %v557_v26 = vadd.f32 %v556_v22, %v542_v50 }
 0x1b5   :  { %v558_v51 = vadd.f32 %v557_v26, %v543_v41 }
 0x1b7   :  { %v559_v52 = vadd.f32 %v558_v51, %v544_v45  ;;  %v1629_v45 = vld [vmem:[%s2859_s1 + $0x170] sm:$0xff] }
 0x1b9   :  { %v560_v53 = vadd.f32 %v559_v52, %v545_v47  ;;  %v1628_v52 = vld [vmem:[%s2859_s1 + $0x168] sm:$0xff] }
 0x1bb   :  { %v561_v54 = vrot.slane %v560_v53, 4 }
 0x1bd   :  { %v562_v55 = vadd.f32 %v561_v54, %v560_v53 }
 0x1bf   :  { %v563_v57 = vrot.slane %v562_v55, 2 }
 0x1c1   :  { %v564_v3 = vadd.f32 %v563_v57, %v562_v55  ;;  %v1627_v55 = vld [vmem:[%s2859_s1 + $0x160] sm:$0xff] }
 0x1c3   :  { %v565_v59 = vrot.slane %v564_v3, 1 }
 0x1c5   :  { %v566_v61 = vadd.f32 %v565_v59, %v564_v3  ;;  %v1626_v59 = vld [vmem:[%s2859_s1 + $0x158] sm:$0xff] }
 0x1c7   :  { %v567_v6 = vmul.f32 %v566_v61, %v512_v10  ;;  %v1773_v10 = vld [vmem:[%s2861_s3] ss:$0 sm:$0xff] }
 0x1c9   :  { %v569_v63 = vadd.f32 1e-05, %v567_v6  ;;  %v1625_v6 = vld [vmem:[%s2859_s1 + $0x150] sm:$0xff] }
 0x1cb   :  { %1783 = vrsqrt.f32 %v569_v63  ;;  %vm576_vm2 = vweird.f32 %v569_v63 }
 0x1d1   :  { %v1784_v9 = vpop.eup %1783 }
 0x1d2   :  { %v571_v1 = vmul.f32 %v1784_v9, %v569_v63  ;;  %vm577_vm1 = vweird.f32 %v1784_v9 }
 0x1d3   :  { %vm578_vm3 = vmor %vm576_vm2, %vm577_vm1 }
 0x1d4   :  { %v572_v25 = vmul.f32 %v1784_v9, %v571_v1 }
 0x1d6   :  { %v573_v30 = vmul.f32 0.5, %v572_v25  ;;  %v1623_v25 = vld [vmem:[%s2859_s1 + $0x140] sm:$0xff] }
 0x1d8   :  { %v574_v35 = vsub.f32 1.5, %v573_v30  ;;  %v1622_v30 = vld [vmem:[%s2859_s1 + $0x138] sm:$0xff] }
 0x1da   :  { %v575_v12 = vmul.f32 %v1784_v9, %v574_v35  ;;  %v1621_v35 = vld [vmem:[%s2859_s1 + $0x130] sm:$0xff] }
 0x1dc   :  { %v579_v11 = vsel %vm578_vm3, %v1784_v9, %v575_v12  ;;  %v1624_v9 = vld [vmem:[%s2859_s1 + $0x148] sm:$0xff]  ;;  %v1619_v12 = vld [vmem:[%s2859_s1 + $0x120] sm:$0xff] }
 0x1dd   :  { %v580_v5 = vmul.f32 %v579_v11, %v568_v2  ;;  %v1620_v2 = vld [vmem:[%s2859_s1 + $0x128] sm:$0xff] }
 0x1df   :  { %v582_v7 = vperm.slane %v580_v5, 0  ;;  %v1618_v5 = vld [vmem:[%s2859_s1 + $0x118] sm:$0xff] }
 0x1e1   :  { %v584_v49 = vmul.f32 %v582_v7, %v2219_v13  ;;  %v585_v58 = vmul.f32 %v582_v7, %v2222_v16  ;;  %v592_v29 = vmul.f32 %v582_v7, %v522_v14  ;;  %v593_v62 = vmul.f32 %v582_v7, %v523_v21 }
 0x1e2   :  { %v594_v33 = vmul.f32 %v582_v7, %v524_v40  ;;  %v595_v34 = vmul.f32 %v582_v7, %v525_v42  ;;  %v596_v20 = vmul.f32 %v582_v7, %v2224_v19  ;;  %v597_v36 = vmul.f32 %v582_v7, %v2227_v15 }
 0x1e3   :  { %v604_v56 = vadd.f32 %v1773_v10, %v584_v49  ;;  %v598_v38 = vmul.f32 %v582_v7, %v2230_v8  ;;  %v599_v23 = vmul.f32 %v582_v7, %v2233_v60  ;;  %v612_v39 = vadd.f32 %v1773_v10, %v592_v29  ;;  %v1615_v49 = vld [vmem:[%s2859_s1 + $0x100] sm:$0xff] }
 0x1e4   :  { %v613_v27 = vadd.f32 %v1773_v10, %v593_v62  ;;  %v614_v32 = vadd.f32 %v1773_v10, %v594_v33  ;;  %v615_v13 = vadd.f32 %v1773_v10, %v595_v34  ;;  %v616_v43 = vadd.f32 %v1773_v10, %v596_v20 }
 0x1e5   :  { %653 = vmatmul.f32.vlgmr.msrb.gmra.mxu1 %v604_v56  ;;  %v617_v17 = vadd.f32 %v1773_v10, %v597_v36  ;;  %v618_v16 = vadd.f32 %v1773_v10, %v598_v38  ;;  %v619_v31 = vadd.f32 %v1773_v10, %v599_v23  ;;  %v605_v14 = vadd.f32 %v1773_v10, %v585_v58 }
 0x1e6   :  { %v586_v21 = vmul.f32 %v582_v7, %v2236_v24  ;;  %v587_v19 = vmul.f32 %v582_v7, %v2243_v18  ;;  %v588_v8 = vmul.f32 %v582_v7, %v2246_v44  ;;  %v589_v42 = vmul.f32 %v582_v7, %v2251_v28 }
 0x1e7   :  { %v590_v48 = vmul.f32 %v582_v7, %v2256_v0  ;;  %v591_v24 = vmul.f32 %v582_v7, %v2261_v4  ;;  %v1630_v4 = vld [vmem:[%s2859_s1 + $0x178] sm:$0xff]  ;;  %v1617_v7 = vld [vmem:[%s2859_s1 + $0x110] sm:$0xff]  ;;  %v1804_v20 = vmov 32.0  }
 0x1e8   :  { %v606_v40 = vadd.f32 %v1773_v10, %v586_v21  ;;  %v607_v15 = vadd.f32 %v1773_v10, %v587_v19  ;;  %v608_v60 = vadd.f32 %v1773_v10, %v588_v8  ;;  %v609_v46 = vadd.f32 %v1773_v10, %v589_v42  ;;  %828 = vmatpush.msrb.mxu2 %v1630_v4 }
 0x1e9   :  { %v610_v37 = vadd.f32 %v1773_v10, %v590_v48  ;;  %v611_v50 = vadd.f32 %v1773_v10, %v591_v24  ;;  %v1616_v10 = vld [vmem:[%s2859_s1 + $0x108] sm:$0xff]  ;;  %1785 = vrcp.f32 %v1804_v20  ;;  %v1644_v20 = vld [vmem:[%s2859_s1 + $0x1d8] sm:$0xff] }
 0x1ea   :  { %829 = vmatpush.msrb.mxu2 %v1629_v45 }
 0x1ec   :  { %830 = vmatpush.msrb.mxu2 %v1628_v52 }
 0x1ed   :  { %656 = vmatmul.f32.gmra.mxu1 %v605_v14 }
 0x1ee   :  { %831 = vmatpush.msrb.mxu2 %v1627_v55 }
 0x1f0   :  { %832 = vmatpush.msrb.mxu2 %v1626_v59 }
 0x1f2   :  { %833 = vmatpush.msrb.mxu2 %v1625_v6 }
 0x1f4   :  { %834 = vmatpush.msrb.mxu2 %v1624_v9  ;;  %v1613_v9 = vld [vmem:[%s2862_s2 + $0x1] sm:$0x1] }
 0x1f5   :  { %659 = vmatmul.f32.gmra.mxu1 %v606_v40 }
 0x1f6   :  { %835 = vmatpush.msrb.mxu2 %v1623_v25 }
 0x1f8   :  { %836 = vmatpush.msrb.mxu2 %v1622_v30 }
 0x1fa   :  { %837 = vmatpush.msrb.mxu2 %v1621_v35 }
 0x1fc   :  { %838 = vmatpush.msrb.mxu2 %v1620_v2  ;;  %v1774_v2 = vld [vmem:[%s2861_s3 + $0x1] ss:$0 sm:$0xff] }
 0x1fd   :  { %662 = vmatmul.f32.gmra.mxu1 %v607_v15 }
 0x1fe   :  { %839 = vmatpush.msrb.mxu2 %v1619_v12 }
 0x200   :  { %840 = vmatpush.msrb.mxu2 %v1618_v5 }
 0x202   :  { %841 = vmatpush.msrb.mxu2 %v1617_v7 }
 0x204   :  { %842 = vmatpush.msrb.mxu2 %v1616_v10 }
 0x205   :  { %665 = vmatmul.f32.gmra.mxu1 %v608_v60 }
 0x206   :  { %843 = vmatpush.msrb.mxu2 %v1615_v49 }
 0x20d   :  { %668 = vmatmul.f32.gmra.mxu1 %v609_v46 }
 0x215   :  { %671 = vmatmul.f32.gmra.mxu1 %v610_v37 }
 0x21d   :  { %674 = vmatmul.f32.gmra.mxu1 %v611_v50 }
 0x225   :  { %677 = vmatmul.f32.gmra.mxu1 %v612_v39  ;;  %v1786_v39 = vpop.eup %1785 }
 0x226   :  { %vm760_vm4 = vweird.f32 %v1786_v39 }
 0x22d   :  { %680 = vmatmul.f32.gmra.mxu1 %v613_v27 }
 0x235   :  { %683 = vmatmul.f32.gmra.mxu1 %v614_v32 }
 0x23d   :  { %686 = vmatmul.f32.gmra.mxu1 %v615_v13  ;;  %v756_v13 = vmul.f32 32.0, %v1786_v39 }
 0x245   :  { %689 = vmatmul.f32.gmra.mxu1 %v616_v43 }
 0x24d   :  { %692 = vmatmul.f32.gmra.mxu1 %v617_v17 }
 0x255   :  { %695 = vmatmul.f32.gmra.mxu1 %v618_v16  ;;  %v757_v16 = vsub.f32 1.0, %v756_v13  ;;  %v1639_v13 = vld [vmem:[%s2859_s1 + $0x1b0] sm:$0xff] }
 0x257   :  { %v758_v21 = vmul.f32 %v1786_v39, %v757_v16  ;;  %v1805_v16 = vmov 8.0  }
 0x259   :  { %v759_v15 = vadd.f32 %v1786_v39, %v758_v21  ;;  %v1635_v21 = vld [vmem:[%s2859_s1 + $0x190] sm:$0xff] }
 0x25b   :  { %v2348_v42 = vsel %vm760_vm4, %v1786_v39, %v759_v15  ;;  %v1641_v39 = vld [vmem:[%s2859_s1 + $0x1c0] sm:$0xff] }
 0x25c   :  { %v1633_v15 = vld [vmem:[%s2859_s1 + $0x180] sm:$0xff] }
 0x25d   :  { %698 = vmatmul.f32.gmra.mxu1 %v619_v31 }
 0x262   :  { %v654_v18 = vpop.f32.mrf.mxu1 }
 0x26a   :  { %v657_v44 = vpop.f32.mrf.mxu1 }
 0x272   :  { %v660_v28 = vpop.f32.mrf.mxu1 }
 0x27a   :  { %v2297_v22 = vpop.f32.mrf.mxu1 }
 0x282   :  { %v666_v0 = vpop.f32.mrf.mxu1 }
 0x283   :  { %v726_v41 = vmax.f32 %v654_v18, %v666_v0 }
 0x28a   :  { %v669_v26 = vpop.f32.mrf.mxu1 }
 0x28b   :  { %v727_v51 = vmax.f32 %v657_v44, %v669_v26 }
 0x292   :  { %v672_v47 = vpop.f32.mrf.mxu1 }
 0x293   :  { %v728_v53 = vmax.f32 %v660_v28, %v672_v47 }
 0x29a   :  { %v675_v54 = vpop.f32.mrf.mxu1 }
 0x29b   :  { %v729_v57 = vmax.f32 %v2297_v22, %v675_v54 }
 0x2a2   :  { %v678_v3 = vpop.f32.mrf.mxu1 }
 0x2aa   :  { %v681_v61 = vpop.f32.mrf.mxu1 }
 0x2b2   :  { %v684_v63 = vpop.f32.mrf.mxu1 }
 0x2ba   :  { %v687_v1 = vpop.f32.mrf.mxu1 }
 0x2c2   :  { %v690_v11 = vpop.f32.mrf.mxu1 }
 0x2c3   :  { %v738_v56 = vmax.f32 %v678_v3, %v690_v11 }
 0x2c5   :  { %v742_v62 = vmax.f32 %v726_v41, %v738_v56 }
 0x2ca   :  { %v693_v58 = vpop.f32.mrf.mxu1 }
 0x2cb   :  { %v739_v29 = vmax.f32 %v681_v61, %v693_v58 }
 0x2cd   :  { %v743_v33 = vmax.f32 %v727_v51, %v739_v29  ;;  %v1648_v29 = vld [vmem:[%s2859_s1 + $0x1f8] sm:$0xff] }
 0x2ce   :  { %932 = vmatpush.msrb.mxu3 %v1648_v29  ;;  %v1663_v29 = vld [vmem:[%s2859_s1 + $0x260] sm:$0xff] }
 0x2cf   :  { %v746_v34 = vadd.f32 %v743_v33, %v742_v62 }
 0x2d2   :  { %v696_v36 = vpop.f32.mrf.mxu1 }
 0x2d3   :  { %v740_v38 = vmax.f32 %v684_v63, %v696_v36 }
 0x2d5   :  { %v744_v23 = vmax.f32 %v728_v53, %v740_v38  ;;  %v1643_v38 = vld [vmem:[%s2859_s1 + $0x1d0] sm:$0xff] }
 0x2d7   :  { %v747_v27 = vadd.f32 %v746_v34, %v744_v23  ;;  %v1645_v34 = vld [vmem:[%s2859_s1 + $0x1e0] sm:$0xff] }
 0x2da   :  { %v699_v32 = vpop.f32.mrf.mxu1 }
 0x2db   :  { %v741_v43 = vmax.f32 %v687_v1, %v699_v32 }
 0x2dd   :  { %v745_v17 = vmax.f32 %v729_v57, %v741_v43  ;;  %v1638_v43 = vld [vmem:[%s2859_s1 + $0x1a8] sm:$0xff] }
 0x2df   :  { %v748_v31 = vadd.f32 %v747_v27, %v745_v17  ;;  %v1640_v27 = vld [vmem:[%s2859_s1 + $0x1b8] sm:$0xff] }
 0x2e1   :  { %v749_v14 = vrot.slane %v748_v31, 4 }
 0x2e3   :  { %v750_v40 = vadd.f32 %v749_v14, %v748_v31  ;;  %v1636_v31 = vld [vmem:[%s2859_s1 + $0x198] sm:$0xff] }
 0x2e5   :  { %v751_v19 = vrot.slane %v750_v40, 2 }
 0x2e7   :  { %v752_v8 = vadd.f32 %v751_v19, %v750_v40  ;;  %v1634_v40 = vld [vmem:[%s2859_s1 + $0x188] sm:$0xff] }
 0x2e9   :  { %v753_v60 = vrot.slane %v752_v8, 1 }
 0x2eb   :  { %v754_v46 = vadd.f32 %v753_v60, %v752_v8 }
 0x2ed   :  { %v762_v48 = vmul.f32 %v2348_v42, %v754_v46 }
 0x2ef   :  { %v763_v37 = vsub.f32 %v742_v62, %v762_v48  ;;  %v764_v24 = vsub.f32 %v743_v33, %v762_v48  ;;  %v765_v50 = vsub.f32 %v744_v23, %v762_v48  ;;  %v766_v18 = vsub.f32 %v745_v17, %v762_v48  ;;  %v1647_v62 = vld [vmem:[%s2859_s1 + $0x1f0] sm:$0xff]  ;;  %v1646_v33 = vld [vmem:[%s2859_s1 + $0x1e8] sm:$0xff]  ;;  %v1637_v17 = vld [vmem:[%s2859_s1 + $0x1a0] sm:$0xff] }
 0x2f0   :  { %933 = vmatpush.msrb.mxu3 %v1647_v62  ;;  %v1642_v23 = vld [vmem:[%s2859_s1 + $0x1c8] sm:$0xff]  ;;  %v1662_v62 = vld [vmem:[%s2859_s1 + $0x258] sm:$0xff] }
 0x2f1   :  { %v767_v44 = vmul.f32 %v763_v37, %v763_v37  ;;  %v768_v28 = vmul.f32 %v764_v24, %v764_v24  ;;  %v769_v22 = vmul.f32 %v765_v50, %v765_v50  ;;  %v770_v4 = vmul.f32 %v766_v18, %v766_v18 }
 0x2f2   :  { %934 = vmatpush.msrb.mxu3 %v1646_v33  ;;  %v1661_v33 = vld [vmem:[%s2859_s1 + $0x250] sm:$0xff] }
 0x2f3   :  { %v771_v0 = vadd.f32 %v768_v28, %v767_v44 }
 0x2f4   :  { %935 = vmatpush.msrb.mxu3 %v1645_v34  ;;  %v1660_v34 = vld [vmem:[%s2859_s1 + $0x248] sm:$0xff] }
 0x2f5   :  { %v772_v41 = vadd.f32 %v771_v0, %v769_v22 }
 0x2f6   :  { %936 = vmatpush.msrb.mxu3 %v1644_v20  ;;  %v1659_v20 = vld [vmem:[%s2859_s1 + $0x240] sm:$0xff] }
 0x2f7   :  { %v773_v26 = vadd.f32 %v772_v41, %v770_v4 }
 0x2f8   :  { %937 = vmatpush.msrb.mxu3 %v1643_v38  ;;  %v1657_v38 = vld [vmem:[%s2859_s1 + $0x230] sm:$0xff] }
 0x2f9   :  { %v774_v45 = vrot.slane %v773_v26, 4 }
 0x2fa   :  { %938 = vmatpush.msrb.mxu3 %v1642_v23  ;;  %v1656_v23 = vld [vmem:[%s2859_s1 + $0x228] sm:$0xff] }
 0x2fb   :  { %v775_v51 = vadd.f32 %v774_v45, %v773_v26 }
 0x2fc   :  { %939 = vmatpush.msrb.mxu3 %v1641_v39  ;;  %v1655_v39 = vld [vmem:[%s2859_s1 + $0x220] sm:$0xff] }
 0x2fd   :  { %v776_v47 = vrot.slane %v775_v51, 2 }
 0x2fe   :  { %940 = vmatpush.msrb.mxu3 %v1640_v27  ;;  %v1654_v27 = vld [vmem:[%s2859_s1 + $0x218] sm:$0xff] }
 0x2ff   :  { %v777_v52 = vadd.f32 %v776_v47, %v775_v51 }
 0x300   :  { %941 = vmatpush.msrb.mxu3 %v1639_v13  ;;  %v1652_v13 = vld [vmem:[%s2859_s1 + $0x208] sm:$0xff] }
 0x301   :  { %v778_v53 = vrot.slane %v777_v52, 1 }
 0x302   :  { %942 = vmatpush.msrb.mxu3 %v1638_v43  ;;  %v1651_v43 = vld [vmem:[%s2859_s1 + $0x200] sm:$0xff] }
 0x303   :  { %v779_v54 = vadd.f32 %v778_v53, %v777_v52 }
 0x304   :  { %943 = vmatpush.msrb.mxu3 %v1637_v17  ;;  %v1806_v17 = vmov 2.0  }
 0x305   :  { %v780_v55 = vmul.f32 %v779_v54, %v2348_v42 }
 0x306   :  { %944 = vmatpush.msrb.mxu3 %v1636_v31 }
 0x307   :  { %v783_v57 = vadd.f32 1e-05, %v780_v55 }
 0x308   :  { %945 = vmatpush.msrb.mxu3 %v1635_v21 }
 0x309   :  { %1787 = vrsqrt.f32 %v783_v57  ;;  %vm790_vm6 = vweird.f32 %v783_v57 }
 0x30a   :  { %1789 = vrcp.f32 %v1805_v16  ;;  %946 = vmatpush.msrb.mxu3 %v1634_v40 }
 0x30c   :  { %947 = vmatpush.msrb.mxu3 %v1633_v15 }
 0x30f   :  { %v1788_v3 = vpop.eup %1787 }
 0x310   :  { %v785_v59 = vmul.f32 %v1788_v3, %v783_v57  ;;  %vm791_vm5 = vweird.f32 %v1788_v3  ;;  %v1790_v19 = vpop.eup %1789 }
 0x311   :  { %vm792_vm7 = vmor %vm790_vm6, %vm791_vm5  ;;  %v875_v8 = vmul.f32 8.0, %v1790_v19  ;;  %vm879_vm8 = vweird.f32 %v1790_v19 }
 0x312   :  { %v786_v61 = vmul.f32 %v1788_v3, %v785_v59 }
 0x314   :  { %v787_v6 = vmul.f32 0.5, %v786_v61 }
 0x316   :  { %v788_v63 = vsub.f32 1.5, %v787_v6 }
 0x318   :  { %v789_v1 = vmul.f32 %v1788_v3, %v788_v63 }
 0x31a   :  { %v793_v25 = vsel %vm792_vm7, %v1788_v3, %v789_v1 }
 0x31b   :  { %v794_v30 = vmul.f32 %v1613_v9, %v793_v25 }
 0x31d   :  { %v796_v35 = vperm.slane %v794_v30, 0  ;;  %v1631_v30 = vld [vmem:[%s2862_s2 + $0x2] sm:$0x1] }
 0x31f   :  { %v798_v12 = vmul.f32 %v796_v35, %v763_v37  ;;  %v799_v11 = vmul.f32 %v796_v35, %v764_v24  ;;  %v800_v5 = vmul.f32 %v796_v35, %v765_v50  ;;  %v801_v7 = vmul.f32 %v796_v35, %v766_v18 }
 0x320   :  { %v876_v37 = vsub.f32 1.0, %v875_v8 }
 0x321   :  { %v807_v10 = vadd.f32 %v1774_v2, %v798_v12  ;;  %v808_v49 = vadd.f32 %v1774_v2, %v799_v11  ;;  %v809_v56 = vadd.f32 %v1774_v2, %v800_v5  ;;  %v810_v58 = vadd.f32 %v1774_v2, %v801_v7  ;;  %v1775_v5 = vld [vmem:[%s2861_s3 + $0x2] ss:$0 sm:$0xff] }
 0x322   :  { %v877_v18 = vmul.f32 %v1790_v19, %v876_v37 }
 0x323   :  { %844 = vmatmul.f32.vlgmr.msrb.gmra.mxu2 %v807_v10 }
 0x324   :  { %v878_v22 = vadd.f32 %v1790_v19, %v877_v18 }
 0x326   :  { %v2406_v41 = vsel %vm879_vm8, %v1790_v19, %v878_v22 }
 0x32b   :  { %847 = vmatmul.f32.gmra.mxu2 %v808_v49  ;;  %v1666_v49 = vld [vmem:[%s2859_s1 + $0x278] sm:$0xff] }
 0x32c   :  { %1027 = vmatpush.msra.mxu2 %v1666_v49 }
 0x333   :  { %850 = vmatmul.f32.gmra.mxu2 %v809_v56  ;;  %v1665_v56 = vld [vmem:[%s2859_s1 + $0x270] sm:$0xff] }
 0x334   :  { %1028 = vmatpush.msra.mxu2 %v1665_v56 }
 0x33b   :  { %853 = vmatmul.f32.gmra.mxu2 %v810_v58  ;;  %v1664_v58 = vld [vmem:[%s2859_s1 + $0x268] sm:$0xff] }
 0x33c   :  { %1029 = vmatpush.msra.mxu2 %v1664_v58 }
 0x33e   :  { %1030 = vmatpush.msra.mxu2 %v1663_v29 }
 0x340   :  { %1031 = vmatpush.msra.mxu2 %v1662_v62 }
 0x342   :  { %1032 = vmatpush.msra.mxu2 %v1661_v33 }
 0x344   :  { %1033 = vmatpush.msra.mxu2 %v1660_v34 }
 0x346   :  { %1034 = vmatpush.msra.mxu2 %v1659_v20 }
 0x3a6   :  { %v845_v36 = vpop.f32.mrf.mxu2 }
 0x3ae   :  { %v848_v32 = vpop.f32.mrf.mxu2 }
 0x3af   :  { %v863_v46 = vmax.f32 %v845_v36, %v848_v32  ;;  %v1658_v36 = vld [vmem:[%s2859_s1 + $0x238] sm:$0xff]  ;;  %v1653_v32 = vld [vmem:[%s2859_s1 + $0x210] sm:$0xff] }
 0x3b0   :  { %1035 = vmatpush.msra.mxu2 %v1658_v36  ;;  %v1684_v36 = vld [vmem:[%s2859_s1 + $0x2f8] sm:$0xff] }
 0x3b1   :  { %1111 = vmatpush.msra.mxu3 %v1684_v36 }
 0x3b2   :  { %1036 = vmatpush.msra.mxu2 %v1657_v38 }
 0x3b4   :  { %1037 = vmatpush.msra.mxu2 %v1656_v23  ;;  %v1683_v23 = vld [vmem:[%s2859_s1 + $0x2f0] sm:$0xff] }
 0x3b5   :  { %1112 = vmatpush.msra.mxu3 %v1683_v23 }
 0x3b6   :  { %v851_v14 = vpop.f32.mrf.mxu2  ;;  %1038 = vmatpush.msra.mxu2 %v1655_v39 }
 0x3b8   :  { %1039 = vmatpush.msra.mxu2 %v1654_v27  ;;  %v1682_v27 = vld [vmem:[%s2859_s1 + $0x2e8] sm:$0xff] }
 0x3b9   :  { %1113 = vmatpush.msra.mxu3 %v1682_v27 }
 0x3ba   :  { %1040 = vmatpush.msra.mxu2 %v1653_v32 }
 0x3bc   :  { %1041 = vmatpush.msra.mxu2 %v1652_v13  ;;  %v1681_v13 = vld [vmem:[%s2859_s1 + $0x2e0] sm:$0xff] }
 0x3bd   :  { %1114 = vmatpush.msra.mxu3 %v1681_v13 }
 0x3be   :  { %v854_v60 = vpop.f32.mrf.mxu2  ;;  %1042 = vmatpush.msra.mxu2 %v1651_v43 }
 0x3bf   :  { %v866_v48 = vmax.f32 %v851_v14, %v854_v60 }
 0x3c1   :  { %v867_v24 = vmax.f32 %v863_v46, %v866_v48 }
 0x3c3   :  { %v868_v50 = vrot.slane %v867_v24, 4 }
 0x3c5   :  { %v869_v44 = vadd.f32 %v868_v50, %v867_v24 }
 0x3c7   :  { %v870_v28 = vrot.slane %v869_v44, 2 }
 0x3c9   :  { %v871_v0 = vadd.f32 %v870_v28, %v869_v44 }
 0x3cb   :  { %v872_v4 = vrot.slane %v871_v0, 1 }
 0x3cd   :  { %v873_v26 = vadd.f32 %v872_v4, %v871_v0 }
 0x3cf   :  { %v881_v45 = vmul.f32 %v2406_v41, %v873_v26 }
 0x3d1   :  { %v882_v51 = vsub.f32 %v867_v24, %v881_v45 }
 0x3d3   :  { %v883_v47 = vmul.f32 %v882_v51, %v882_v51 }
 0x3d5   :  { %v884_v52 = vrot.slane %v883_v47, 4 }
 0x3d7   :  { %v885_v53 = vadd.f32 %v884_v52, %v883_v47 }
 0x3d9   :  { %v886_v54 = vrot.slane %v885_v53, 2 }
 0x3db   :  { %v887_v55 = vadd.f32 %v886_v54, %v885_v53 }
 0x3dd   :  { %v888_v57 = vrot.slane %v887_v55, 1 }
 0x3df   :  { %v889_v3 = vadd.f32 %v888_v57, %v887_v55 }
 0x3e1   :  { %v890_v59 = vmul.f32 %v889_v3, %v2406_v41 }
 0x3e3   :  { %v893_v61 = vadd.f32 1e-05, %v890_v59 }
 0x3e5   :  { %1791 = vrsqrt.f32 %v893_v61  ;;  %vm900_vm10 = vweird.f32 %v893_v61 }
 0x3e6   :  { %1793 = vrcp.f32 %v1806_v17  ;;  %v1680_v17 = vld [vmem:[%s2859_s1 + $0x2d8] sm:$0xff] }
 0x3e7   :  { %1115 = vmatpush.msra.mxu3 %v1680_v17 }
 0x3eb   :  { %v1792_v6 = vpop.eup %1791 }
 0x3ec   :  { %v895_v63 = vmul.f32 %v1792_v6, %v893_v61  ;;  %vm901_vm9 = vweird.f32 %v1792_v6  ;;  %v1794_v31 = vpop.eup %1793 }
 0x3ed   :  { %vm902_vm11 = vmor %vm900_vm10, %vm901_vm9  ;;  %v969_v14 = vmul.f32 2.0, %v1794_v31  ;;  %vm973_vm13 = vweird.f32 %v1794_v31 }
 0x3ee   :  { %v896_v9 = vmul.f32 %v1792_v6, %v895_v63 }
 0x3ef   :  { %v970_v48 = vsub.f32 1.0, %v969_v14  ;;  %v1679_v14 = vld [vmem:[%s2859_s1 + $0x2d0] sm:$0xff] }
 0x3f0   :  { %v897_v1 = vmul.f32 0.5, %v896_v9  ;;  %1116 = vmatpush.msra.mxu3 %v1679_v14  ;;  %v1687_v14 = vld [vmem:[%s2859_s1 + $0x300] sm:$0xff] }
 0x3f1   :  { %v971_v50 = vmul.f32 %v1794_v31, %v970_v48  ;;  %v1675_v48 = vld [vmem:[%s2859_s1 + $0x2b0] sm:$0xff] }
 0x3f2   :  { %v898_v25 = vsub.f32 1.5, %v897_v1 }
 0x3f3   :  { %v972_v28 = vadd.f32 %v1794_v31, %v971_v50 }
 0x3f4   :  { %v899_v35 = vmul.f32 %v1792_v6, %v898_v25 }
 0x3f5   :  { %v2465_v4 = vsel %vm973_vm13, %v1794_v31, %v972_v28 }
 0x3f6   :  { %v903_v2 = vsel %vm902_vm11, %v1792_v6, %v899_v35  ;;  %v1649_v35 = vld [vmem:[%s2862_s2 + $0x3] sm:$0x1] }
 0x3f7   :  { %v904_v12 = vmul.f32 %v1631_v30, %v903_v2 }
 0x3f9   :  { %v906_v11 = vperm.slane %v904_v12, 0 }
 0x3fb   :  { %v908_v7 = vmul.f32 %v906_v11, %v882_v51 }
 0x3fd   :  { %v914_v10 = vadd.f32 %v1775_v5, %v908_v7  ;;  %v1776_v7 = vld [vmem:[%s2861_s3 + $0x3] ss:$0 sm:$0xff] }
 0x3ff   :  { %948 = vmatmul.f32.vlgmr.msrb.gmra.mxu3 %v914_v10 }
 0x482   :  { %v949_v16 = vpop.f32.mrf.mxu3 }
 0x483   :  { %952 = vst [vmem:[#allocation2] sm:$0xff] %v949_v16 }
 0x48a   :  { %v953_v21 = vld [vmem:[#allocation2] sm:$0x3]  ;;  %v954_v40 = vld [vmem:[#allocation2 + $0x2] sm:$0x3]  ;;  %v956_v19 = vld [vmem:[#allocation2 + $0x4] sm:$0x3] }
 0x48b   :  { %v955_v15 = vmax.f32 %v953_v21, %v954_v40  ;;  %v957_v8 = vld [vmem:[#allocation2 + $0x6] sm:$0x3]  ;;  %v1678_v40 = vld [vmem:[%s2859_s1 + $0x2c8] sm:$0xff] }
 0x48c   :  { %v958_v60 = vmax.f32 %v956_v19, %v957_v8  ;;  %1117 = vmatpush.msra.mxu3 %v1678_v40 }
 0x48e   :  { %v959_v46 = vmax.f32 %v955_v15, %v958_v60  ;;  %v1677_v15 = vld [vmem:[%s2859_s1 + $0x2c0] sm:$0xff]  ;;  %v1676_v60 = vld [vmem:[%s2859_s1 + $0x2b8] sm:$0xff] }
 0x48f   :  { %1118 = vmatpush.msra.mxu3 %v1677_v15 }
 0x490   :  { %v961_v37 = vsel %vm960_vm12, %v959_v46, 0.0 }
 0x491   :  { %v962_v24 = vrot.slane %v961_v37, 4  ;;  %1119 = vmatpush.msra.mxu3 %v1676_v60 }
 0x493   :  { %v963_v18 = vadd.f32 %v962_v24, %v961_v37  ;;  %1120 = vmatpush.msra.mxu3 %v1675_v48  ;;  %v1674_v24 = vld [vmem:[%s2859_s1 + $0x2a8] sm:$0xff] }
 0x495   :  { %v964_v44 = vrot.slane %v963_v18, 2  ;;  %1121 = vmatpush.msra.mxu3 %v1674_v24 }
 0x497   :  { %v965_v22 = vadd.f32 %v964_v44, %v963_v18  ;;  %v1673_v18 = vld [vmem:[%s2859_s1 + $0x2a0] sm:$0xff]  ;;  %v1672_v44 = vld [vmem:[%s2859_s1 + $0x298] sm:$0xff] }
 0x498   :  { %1122 = vmatpush.msra.mxu3 %v1673_v18 }
 0x499   :  { %v966_v0 = vrot.slane %v965_v22, 1 }
 0x49a   :  { %1123 = vmatpush.msra.mxu3 %v1672_v44 }
 0x49b   :  { %v967_v26 = vadd.f32 %v966_v0, %v965_v22  ;;  %v1671_v22 = vld [vmem:[%s2859_s1 + $0x290] sm:$0xff]  ;;  %v1670_v0 = vld [vmem:[%s2859_s1 + $0x288] sm:$0xff] }
 0x49c   :  { %1124 = vmatpush.msra.mxu3 %v1671_v22 }
 0x49d   :  { %v975_v45 = vmul.f32 %v2465_v4, %v967_v26 }
 0x49e   :  { %1125 = vmatpush.msra.mxu3 %v1670_v0 }
 0x49f   :  { %v976_v51 = vsub.f32 %v959_v46, %v975_v45 }
 0x4a1   :  { %v977_v47 = vmul.f32 %v976_v51, %v976_v51 }
 0x4a3   :  { %v978_v52 = vsel %vm960_vm12, %v977_v47, 0.0 }
 0x4a4   :  { %v979_v53 = vrot.slane %v978_v52, 4 }
 0x4a6   :  { %v980_v54 = vadd.f32 %v979_v53, %v978_v52  ;;  %v1667_v53 = vld [vmem:[%s2862_s2 + $0x4] sm:$0x1] }
 0x4a8   :  { %v981_v55 = vrot.slane %v980_v54, 2 }
 0x4aa   :  { %v982_v57 = vadd.f32 %v981_v55, %v980_v54 }
 0x4ac   :  { %v983_v3 = vrot.slane %v982_v57, 1 }
 0x4ae   :  { %v984_v59 = vadd.f32 %v983_v3, %v982_v57 }
 0x4b0   :  { %v985_v61 = vmul.f32 %v984_v59, %v2465_v4  ;;  %v1777_v59 = vld [vmem:[%s2861_s3 + $0x4] ss:$0 sm:$0xff] }
 0x4b2   :  { %v988_v6 = vadd.f32 1e-05, %v985_v61 }
 0x4b4   :  { %1795 = vrsqrt.f32 %v988_v6  ;;  %vm995_vm15 = vweird.f32 %v988_v6 }
 0x4ba   :  { %v1796_v63 = vpop.eup %1795 }
 0x4bb   :  { %v990_v9 = vmul.f32 %v1796_v63, %v988_v6  ;;  %vm996_vm14 = vweird.f32 %v1796_v63 }
 0x4bc   :  { %vm997_vm0 = vmor %vm995_vm15, %vm996_vm14 }
 0x4bd   :  { %v991_v1 = vmul.f32 %v1796_v63, %v990_v9  ;;  %v1702_v9 = vld [vmem:[%s2859_s1 + $0x378] sm:$0xff] }
 0x4be   :  { %1196 = vmatpush.msrb.mxu2 %v1702_v9 }
 0x4bf   :  { %v992_v25 = vmul.f32 0.5, %v991_v1 }
 0x4c1   :  { %v993_v30 = vsub.f32 1.5, %v992_v25  ;;  %v1701_v25 = vld [vmem:[%s2859_s1 + $0x370] sm:$0xff] }
 0x4c2   :  { %1197 = vmatpush.msrb.mxu2 %v1701_v25 }
 0x4c3   :  { %v994_v2 = vmul.f32 %v1796_v63, %v993_v30 }
 0x4c5   :  { %v998_v12 = vsel %vm997_vm0, %v1796_v63, %v994_v2 }
 0x4c6   :  { %v999_v11 = vmul.f32 %v1649_v35, %v998_v12  ;;  %v1700_v35 = vld [vmem:[%s2859_s1 + $0x368] sm:$0xff]  ;;  %v1699_v12 = vld [vmem:[%s2859_s1 + $0x360] sm:$0xff] }
 0x4c7   :  { %1198 = vmatpush.msrb.mxu2 %v1700_v35 }
 0x4c8   :  { %v1001_v5 = vperm.slane %v999_v11, 0 }
 0x4c9   :  { %1199 = vmatpush.msrb.mxu2 %v1699_v12 }
 0x4ca   :  { %v1003_v10 = vmul.f32 %v1001_v5, %v976_v51  ;;  %v1698_v5 = vld [vmem:[%s2859_s1 + $0x358] sm:$0xff] }
 0x4cb   :  { %1200 = vmatpush.msrb.mxu2 %v1698_v5 }
 0x4cc   :  { %v1009_v49 = vadd.f32 %v1776_v7, %v1003_v10  ;;  %v1697_v10 = vld [vmem:[%s2859_s1 + $0x350] sm:$0xff] }
 0x4cd   :  { %1201 = vmatpush.msrb.mxu2 %v1697_v10 }
 0x4ce   :  { %1043 = vmatmul.f32.vlgmr.msra.gmra.mxu2 %v1009_v49 }
 0x551   :  { %v1044_v56 = vpop.f32.mrf.mxu2 }
 0x552   :  { %v1047_v58 = vsel %vm960_vm12, %v1044_v56, 0.0 }
 0x553   :  { %v1048_v29 = vrot.slane %v1047_v58, 4 }
 0x555   :  { %v1049_v62 = vadd.f32 %v1048_v29, %v1047_v58  ;;  %v1695_v29 = vld [vmem:[%s2859_s1 + $0x340] sm:$0xff] }
 0x557   :  { %v1050_v33 = vrot.slane %v1049_v62, 2 }
 0x559   :  { %v1051_v34 = vadd.f32 %v1050_v33, %v1049_v62  ;;  %v1694_v33 = vld [vmem:[%s2859_s1 + $0x338] sm:$0xff] }
 0x55b   :  { %v1052_v20 = vrot.slane %v1051_v34, 1 }
 0x55d   :  { %v1053_v38 = vadd.f32 %v1052_v20, %v1051_v34  ;;  %v1693_v20 = vld [vmem:[%s2859_s1 + $0x330] sm:$0xff] }
 0x55f   :  { %v1054_v39 = vmul.f32 %v1053_v38, %v2465_v4  ;;  %v1692_v38 = vld [vmem:[%s2859_s1 + $0x328] sm:$0xff] }
 0x561   :  { %v1055_v32 = vsub.f32 %v1044_v56, %v1054_v39  ;;  %v1696_v56 = vld [vmem:[%s2859_s1 + $0x348] sm:$0xff]  ;;  %v1691_v39 = vld [vmem:[%s2859_s1 + $0x320] sm:$0xff] }
 0x562   :  { %1202 = vmatpush.msrb.mxu2 %v1696_v56 }
 0x563   :  { %v1056_v43 = vmul.f32 %v1055_v32, %v1055_v32 }
 0x564   :  { %1203 = vmatpush.msrb.mxu2 %v1695_v29  ;;  %v1712_v29 = vld [vmem:[%s2859_s1 + $0x3b8] sm:$0xff] }
 0x565   :  { %v1057_v16 = vsel %vm960_vm12, %v1056_v43, 0.0  ;;  %v1689_v43 = vld [vmem:[%s2859_s1 + $0x310] sm:$0xff] }
 0x566   :  { %v1058_v31 = vrot.slane %v1057_v16, 4  ;;  %1204 = vmatpush.msrb.mxu2 %v1694_v33 }
 0x568   :  { %v1059_v21 = vadd.f32 %v1058_v31, %v1057_v16  ;;  %1205 = vmatpush.msrb.mxu2 %v1693_v20  ;;  %v1688_v16 = vld [vmem:[%s2859_s1 + $0x308] sm:$0xff] }
 0x56a   :  { %v1060_v19 = vrot.slane %v1059_v21, 2  ;;  %1206 = vmatpush.msrb.mxu2 %v1692_v38 }
 0x56c   :  { %v1061_v8 = vadd.f32 %v1060_v19, %v1059_v21  ;;  %1207 = vmatpush.msrb.mxu2 %v1691_v39 }
 0x56e   :  { %v1062_v46 = vrot.slane %v1061_v8, 1 }
 0x570   :  { %v1063_v37 = vadd.f32 %v1062_v46, %v1061_v8 }
 0x572   :  { %v1064_v50 = vmul.f32 %v1063_v37, %v2465_v4  ;;  %v1669_v4 = vld [vmem:[%s2859_s1 + $0x280] sm:$0xff] }
 0x573   :  { %1126 = vmatpush.msra.mxu3 %v1669_v4  ;;  %v1685_v37 = vld [vmem:[%s2862_s2 + $0x5] sm:$0x1] }
 0x574   :  { %v1067_v28 = vadd.f32 1e-05, %v1064_v50 }
 0x576   :  { %1797 = vrsqrt.f32 %v1067_v28  ;;  %vm1074_vm2 = vweird.f32 %v1067_v28 }
 0x57c   :  { %v1798_v26 = vpop.eup %1797 }
 0x57d   :  { %v1069_v45 = vmul.f32 %v1798_v26, %v1067_v28  ;;  %vm1075_vm1 = vweird.f32 %v1798_v26 }
 0x57e   :  { %vm1076_vm3 = vmor %vm1074_vm2, %vm1075_vm1 }
 0x57f   :  { %v1070_v51 = vmul.f32 %v1798_v26, %v1069_v45 }
 0x581   :  { %v1071_v47 = vmul.f32 0.5, %v1070_v51 }
 0x583   :  { %v1072_v52 = vsub.f32 1.5, %v1071_v47 }
 0x585   :  { %v1073_v54 = vmul.f32 %v1798_v26, %v1072_v52 }
 0x587   :  { %v1077_v55 = vsel %vm1076_vm3, %v1798_v26, %v1073_v54 }
 0x588   :  { %v1078_v57 = vmul.f32 %v1667_v53, %v1077_v55  ;;  %v1720_v55 = vld [vmem:[%s2859_s1 + $0x3f8] sm:$0xff] }
 0x589   :  { %1336 = vmatpush.msrb.mxu3 %v1720_v55 }
 0x58a   :  { %v1080_v3 = vperm.slane %v1078_v57, 0 }
 0x58c   :  { %v1082_v61 = vmul.f32 %v1080_v3, %v1055_v32  ;;  %v1690_v32 = vld [vmem:[%s2859_s1 + $0x318] sm:$0xff]  ;;  %v1719_v3 = vld [vmem:[%s2859_s1 + $0x3f0] sm:$0xff] }
 0x58d   :  { %1208 = vmatpush.msrb.mxu2 %v1690_v32  ;;  %1337 = vmatpush.msrb.mxu3 %v1719_v3 }
 0x58e   :  { %v1088_v6 = vadd.f32 %v1777_v59, %v1082_v61  ;;  %v1718_v61 = vld [vmem:[%s2859_s1 + $0x3e8] sm:$0xff] }
 0x58f   :  { %1209 = vmatpush.msrb.mxu2 %v1689_v43  ;;  %1338 = vmatpush.msrb.mxu3 %v1718_v61 }
 0x590   :  { %1089 = vst [vmem:[#allocation2] sm:$0x3] %v1088_v6 }
 0x591   :  { %1090 = vst [vmem:[#allocation2 + $0x2] sm:$0x3] %v1088_v6  ;;  %1210 = vmatpush.msrb.mxu2 %v1688_v16 }
 0x592   :  { %1091 = vst [vmem:[#allocation2 + $0x4] sm:$0x3] %v1088_v6 }
 0x593   :  { %1092 = vst [vmem:[#allocation2 + $0x6] sm:$0x3] %v1088_v6  ;;  %1211 = vmatpush.msrb.mxu2 %v1687_v14 }
 0x59a   :  { %v1093_v63 = vld [vmem:[#allocation2] sm:$0xff] }
 0x59b   :  { %1127 = vmatmul.f32.vlgmr.msra.gmra.mxu3 %v1093_v63  ;;  %v1717_v63 = vld [vmem:[%s2859_s1 + $0x3e0] sm:$0xff] }
 0x59c   :  { %1339 = vmatpush.msrb.mxu3 %v1717_v63 }
 0x61e   :  { %v1128_v1 = vpop.f32.mrf.mxu3 }
 0x61f   :  { %v1131_v30 = vrot.slane %v1128_v1, 4 }
 0x621   :  { %v1132_v2 = vadd.f32 %v1131_v30, %v1128_v1  ;;  %v1715_v30 = vld [vmem:[%s2859_s1 + $0x3d0] sm:$0xff] }
 0x623   :  { %v1133_v11 = vrot.slane %v1132_v2, 2 }
 0x625   :  { %v1134_v7 = vadd.f32 %v1133_v11, %v1132_v2  ;;  %v1714_v11 = vld [vmem:[%s2859_s1 + $0x3c8] sm:$0xff] }
 0x627   :  { %v1135_v49 = vrot.slane %v1134_v7, 1 }
 0x629   :  { %v1136_v58 = vadd.f32 %v1135_v49, %v1134_v7  ;;  %v1713_v49 = vld [vmem:[%s2859_s1 + $0x3c0] sm:$0xff] }
 0x62b   :  { %v1137_v62 = vmul.f32 %v1136_v58, %v2406_v41 }
 0x62d   :  { %v1138_v34 = vsub.f32 %v1128_v1, %v1137_v62  ;;  %v1716_v1 = vld [vmem:[%s2859_s1 + $0x3d8] sm:$0xff] }
 0x62e   :  { %1340 = vmatpush.msrb.mxu3 %v1716_v1 }
 0x62f   :  { %v1139_v36 = vmul.f32 %v1138_v34, %v1138_v34 }
 0x630   :  { %1341 = vmatpush.msrb.mxu3 %v1715_v30 }
 0x631   :  { %v1140_v23 = vrot.slane %v1139_v36, 4 }
 0x632   :  { %1342 = vmatpush.msrb.mxu3 %v1714_v11 }
 0x633   :  { %v1141_v27 = vadd.f32 %v1140_v23, %v1139_v36  ;;  %v1710_v36 = vld [vmem:[%s2859_s1 + $0x3a8] sm:$0xff]  ;;  %v1709_v23 = vld [vmem:[%s2859_s1 + $0x3a0] sm:$0xff] }
 0x634   :  { %1343 = vmatpush.msrb.mxu3 %v1713_v49 }
 0x635   :  { %v1142_v13 = vrot.slane %v1141_v27, 2 }
 0x636   :  { %1344 = vmatpush.msrb.mxu3 %v1712_v29 }
 0x637   :  { %v1143_v17 = vadd.f32 %v1142_v13, %v1141_v27  ;;  %v1708_v27 = vld [vmem:[%s2859_s1 + $0x398] sm:$0xff]  ;;  %v1707_v13 = vld [vmem:[%s2859_s1 + $0x390] sm:$0xff] }
 0x639   :  { %v1144_v31 = vrot.slane %v1143_v17, 1 }
 0x63b   :  { %v1145_v21 = vadd.f32 %v1144_v31, %v1143_v17  ;;  %v1706_v17 = vld [vmem:[%s2859_s1 + $0x388] sm:$0xff]  ;;  %v1705_v31 = vld [vmem:[%s2859_s1 + $0x380] sm:$0xff] }
 0x63d   :  { %v1146_v40 = vmul.f32 %v1145_v21, %v2406_v41  ;;  %v1778_v41 = vld [vmem:[%s2861_s3 + $0x5] ss:$0 sm:$0xff] }
 0x63f   :  { %v1149_v19 = vadd.f32 1e-05, %v1146_v40 }
 0x641   :  { %1799 = vrsqrt.f32 %v1149_v19  ;;  %vm1156_vm5 = vweird.f32 %v1149_v19 }
 0x647   :  { %v1800_v15 = vpop.eup %1799 }
 0x648   :  { %v1151_v8 = vmul.f32 %v1800_v15, %v1149_v19  ;;  %vm1157_vm4 = vweird.f32 %v1800_v15 }
 0x649   :  { %vm1158_vm6 = vmor %vm1156_vm5, %vm1157_vm4 }
 0x64a   :  { %v1152_v60 = vmul.f32 %v1800_v15, %v1151_v8 }
 0x64c   :  { %v1153_v46 = vmul.f32 0.5, %v1152_v60 }
 0x64e   :  { %v1154_v48 = vsub.f32 1.5, %v1153_v46 }
 0x650   :  { %v1155_v24 = vmul.f32 %v1800_v15, %v1154_v48  ;;  %v1703_v48 = vld [vmem:[%s2862_s2 + $0x6] sm:$0x1] }
 0x652   :  { %v1159_v50 = vsel %vm1158_vm6, %v1800_v15, %v1155_v24 }
 0x653   :  { %v1160_v18 = vmul.f32 %v1685_v37, %v1159_v50 }
 0x655   :  { %v1162_v44 = vperm.slane %v1160_v18, 0 }
 0x657   :  { %v1164_v28 = vmul.f32 %v1162_v44, %v1138_v34  ;;  %v1711_v34 = vld [vmem:[%s2859_s1 + $0x3b0] sm:$0xff] }
 0x658   :  { %1345 = vmatpush.msrb.mxu3 %v1711_v34 }
 0x659   :  { %v1170_v22 = vadd.f32 %v1778_v41, %v1164_v28 }
 0x65a   :  { %1346 = vmatpush.msrb.mxu3 %v1710_v36 }
 0x65b   :  { %1212 = vmatmul.f32.vlgmr.msrb.gmra.mxu2 %v1170_v22 }
 0x65c   :  { %1347 = vmatpush.msrb.mxu3 %v1709_v23 }
 0x65e   :  { %1348 = vmatpush.msrb.mxu3 %v1708_v27 }
 0x660   :  { %1349 = vmatpush.msrb.mxu3 %v1707_v13 }
 0x662   :  { %1350 = vmatpush.msrb.mxu3 %v1706_v17 }
 0x663   :  { %1215 = vmatmul.f32.gmra.mxu2 %v1170_v22 }
 0x664   :  { %1351 = vmatpush.msrb.mxu3 %v1705_v31 }
 0x66b   :  { %1218 = vmatmul.f32.gmra.mxu2 %v1170_v22 }
 0x673   :  { %1221 = vmatmul.f32.gmra.mxu2 %v1170_v22 }
 0x6de   :  { %v1213_v0 = vpop.f32.mrf.mxu2 }
 0x6e6   :  { %v1216_v4 = vpop.f32.mrf.mxu2 }
 0x6e7   :  { %v1225_v45 = vadd.f32 %v1216_v4, %v1213_v0 }
 0x6ee   :  { %v1219_v26 = vpop.f32.mrf.mxu2 }
 0x6ef   :  { %v1226_v51 = vadd.f32 %v1225_v45, %v1219_v26 }
 0x6f6   :  { %v1222_v47 = vpop.f32.mrf.mxu2 }
 0x6f7   :  { %v1227_v52 = vadd.f32 %v1226_v51, %v1222_v47  ;;  %v2649_v51 = vld [vmem:[%s2863_s4] ss:$0 sm:$0xff] }
 0x6f9   :  { %v1228_v53 = vrot.slane %v1227_v52, 4 }
 0x6fb   :  { %v1229_v54 = vadd.f32 %v1228_v53, %v1227_v52 }
 0x6fd   :  { %v1230_v57 = vrot.slane %v1229_v54, 2 }
 0x6ff   :  { %v1231_v59 = vadd.f32 %v1230_v57, %v1229_v54 }
 0x701   :  { %v1232_v6 = vrot.slane %v1231_v59, 1 }
 0x703   :  { %v1233_v9 = vadd.f32 %v1232_v6, %v1231_v59 }
 0x705   :  { %v1234_v25 = vmul.f32 %v1233_v9, %v2348_v42 }
 0x707   :  { %v1235_v35 = vsub.f32 %v1213_v0, %v1234_v25  ;;  %v1236_v2 = vsub.f32 %v1216_v4, %v1234_v25  ;;  %v1237_v12 = vsub.f32 %v1219_v26, %v1234_v25  ;;  %v1238_v5 = vsub.f32 %v1222_v47, %v1234_v25 }
 0x709   :  { %v1239_v7 = vmul.f32 %v1235_v35, %v1235_v35  ;;  %v1240_v10 = vmul.f32 %v1236_v2, %v1236_v2  ;;  %v1241_v56 = vmul.f32 %v1237_v12, %v1237_v12  ;;  %v1242_v62 = vmul.f32 %v1238_v5, %v1238_v5 }
 0x70b   :  { %v1243_v58 = vadd.f32 %v1240_v10, %v1239_v7 }
 0x70d   :  { %v1244_v33 = vadd.f32 %v1243_v58, %v1241_v56 }
 0x70f   :  { %v1245_v20 = vadd.f32 %v1244_v33, %v1242_v62 }
 0x711   :  { %v1246_v38 = vrot.slane %v1245_v20, 4 }
 0x713   :  { %v1247_v39 = vadd.f32 %v1246_v38, %v1245_v20 }
 0x715   :  { %v1248_v32 = vrot.slane %v1247_v39, 2 }
 0x717   :  { %v1249_v43 = vadd.f32 %v1248_v32, %v1247_v39 }
 0x719   :  { %v1250_v16 = vrot.slane %v1249_v43, 1 }
 0x71b   :  { %v1251_v14 = vadd.f32 %v1250_v16, %v1249_v43 }
 0x71d   :  { %v1252_v21 = vmul.f32 %v1251_v14, %v2348_v42  ;;  %v1779_v42 = vld [vmem:[%s2861_s3 + $0x6] ss:$0 sm:$0xff] }
 0x71f   :  { %v1255_v40 = vadd.f32 1e-05, %v1252_v21 }
 0x721   :  { %1801 = vrsqrt.f32 %v1255_v40  ;;  %vm1262_vm8 = vweird.f32 %v1255_v40 }
 0x727   :  { %v1802_v19 = vpop.eup %1801 }
 0x728   :  { %v1257_v15 = vmul.f32 %v1802_v19, %v1255_v40  ;;  %vm1263_vm7 = vweird.f32 %v1802_v19 }
 0x729   :  { %vm1264_vm9 = vmor %vm1262_vm8, %vm1263_vm7 }
 0x72a   :  { %v1258_v8 = vmul.f32 %v1802_v19, %v1257_v15 }
 0x72c   :  { %v1259_v60 = vmul.f32 0.5, %v1258_v8 }
 0x72e   :  { %v1260_v46 = vsub.f32 1.5, %v1259_v60 }
 0x730   :  { %v1261_v37 = vmul.f32 %v1802_v19, %v1260_v46 }
 0x732   :  { %v1265_v24 = vsel %vm1264_vm9, %v1802_v19, %v1261_v37 }
 0x733   :  { %v1266_v50 = vmul.f32 %v1703_v48, %v1265_v24 }
 0x735   :  { %v1268_v18 = vperm.slane %v1266_v50, 0 }
 0x737   :  { %v1270_v44 = vmul.f32 %v1268_v18, %v1235_v35  ;;  %v1271_v28 = vmul.f32 %v1268_v18, %v1236_v2  ;;  %v1272_v0 = vmul.f32 %v1268_v18, %v1237_v12  ;;  %v1273_v26 = vmul.f32 %v1268_v18, %v1238_v5 }
 0x739   :  { %v1279_v41 = vadd.f32 %v1779_v42, %v1270_v44  ;;  %v1280_v22 = vadd.f32 %v1779_v42, %v1271_v28  ;;  %v1281_v4 = vadd.f32 %v1779_v42, %v1272_v0  ;;  %v1282_v45 = vadd.f32 %v1779_v42, %v1273_v26 }
 0x73b   :  { %1352 = vmatmul.f32.vlgmr.msrb.gmra.mxu3 %v1279_v41 }
 0x743   :  { %1355 = vmatmul.f32.gmra.mxu3 %v1280_v22 }
 0x74b   :  { %1358 = vmatmul.f32.gmra.mxu3 %v1281_v4 }
 0x753   :  { %1361 = vmatmul.f32.gmra.mxu3 %v1282_v45 }
 0x75b   :  { %1364 = vmatmul.f32.gmra.mxu3 %v1279_v41 }
 0x763   :  { %1367 = vmatmul.f32.gmra.mxu3 %v1280_v22 }
 0x76b   :  { %1370 = vmatmul.f32.gmra.mxu3 %v1281_v4 }
 0x773   :  { %1373 = vmatmul.f32.gmra.mxu3 %v1282_v45 }
 0x77b   :  { %1376 = vmatmul.f32.gmra.mxu3 %v1279_v41 }
 0x783   :  { %1379 = vmatmul.f32.gmra.mxu3 %v1280_v22 }
 0x78b   :  { %1382 = vmatmul.f32.gmra.mxu3 %v1281_v4 }
 0x793   :  { %1385 = vmatmul.f32.gmra.mxu3 %v1282_v45 }
 0x79b   :  { %1388 = vmatmul.f32.gmra.mxu3 %v1279_v41 }
 0x7a3   :  { %1391 = vmatmul.f32.gmra.mxu3 %v1280_v22 }
 0x7ab   :  { %1394 = vmatmul.f32.gmra.mxu3 %v1281_v4 }
 0x7b3   :  { %1397 = vmatmul.f32.gmra.mxu3 %v1282_v45 }
 0x7be   :  { %v1353_v47 = vpop.f32.mrf.mxu3 }
 0x7bf   :  { %v1354_v52 = vadd.f32 %v2649_v51, %v1353_v47 }
 0x7c1   :  { %1401 = vst [vmem:[#allocation2] sm:$0xff] %v1354_v52 }
 0x7c2   :  { %1529 = vst [vmem:[%s2864_s5] sm:$0xff] %v1354_v52 }
 0x7c3   :  { %1545 = vst [vmem:[%s2864_s5 + $0x80] sm:$0xff] %v1354_v52 }
 0x7c4   :  { %1561 = vst [vmem:[%s2864_s5 + $0x100] sm:$0xff] %v1354_v52 }
 0x7c5   :  { %1577 = vst [vmem:[%s2864_s5 + $0x180] sm:$0xff] %v1354_v52 }
 0x7c6   :  { %v1356_v53 = vpop.f32.mrf.mxu3 }
 0x7c7   :  { %v1357_v54 = vadd.f32 %v2649_v51, %v1356_v53 }
 0x7c9   :  { %1530 = vst [vmem:[%s2864_s5 + $0x8] sm:$0xff] %v1357_v54 }
 0x7ca   :  { %1546 = vst [vmem:[%s2864_s5 + $0x88] sm:$0xff] %v1357_v54 }
 0x7cb   :  { %1562 = vst [vmem:[%s2864_s5 + $0x108] sm:$0xff] %v1357_v54 }
 0x7cc   :  { %1578 = vst [vmem:[%s2864_s5 + $0x188] sm:$0xff] %v1357_v54 }
 0x7ce   :  { %v1359_v55 = vpop.f32.mrf.mxu3 }
 0x7cf   :  { %v1360_v57 = vadd.f32 %v2649_v51, %v1359_v55 }
 0x7d1   :  { %1531 = vst [vmem:[%s2864_s5 + $0x10] sm:$0xff] %v1360_v57 }
 0x7d2   :  { %1547 = vst [vmem:[%s2864_s5 + $0x90] sm:$0xff] %v1360_v57 }
 0x7d3   :  { %1563 = vst [vmem:[%s2864_s5 + $0x110] sm:$0xff] %v1360_v57 }
 0x7d4   :  { %1579 = vst [vmem:[%s2864_s5 + $0x190] sm:$0xff] %v1360_v57 }
 0x7d6   :  { %v1362_v3 = vpop.f32.mrf.mxu3 }
 0x7d7   :  { %v1363_v59 = vadd.f32 %v2649_v51, %v1362_v3 }
 0x7d9   :  { %1532 = vst [vmem:[%s2864_s5 + $0x18] sm:$0xff] %v1363_v59 }
 0x7da   :  { %1548 = vst [vmem:[%s2864_s5 + $0x98] sm:$0xff] %v1363_v59 }
 0x7db   :  { %1564 = vst [vmem:[%s2864_s5 + $0x118] sm:$0xff] %v1363_v59 }
 0x7dc   :  { %1580 = vst [vmem:[%s2864_s5 + $0x198] sm:$0xff] %v1363_v59 }
 0x7de   :  { %v1365_v61 = vpop.f32.mrf.mxu3 }
 0x7df   :  { %v1366_v6 = vadd.f32 %v2649_v51, %v1365_v61 }
 0x7e1   :  { %1533 = vst [vmem:[%s2864_s5 + $0x20] sm:$0xff] %v1366_v6 }
 0x7e2   :  { %1549 = vst [vmem:[%s2864_s5 + $0xa0] sm:$0xff] %v1366_v6 }
 0x7e3   :  { %1565 = vst [vmem:[%s2864_s5 + $0x120] sm:$0xff] %v1366_v6 }
 0x7e4   :  { %1581 = vst [vmem:[%s2864_s5 + $0x1a0] sm:$0xff] %v1366_v6 }
 0x7e6   :  { %v1368_v63 = vpop.f32.mrf.mxu3 }
 0x7e7   :  { %v1369_v9 = vadd.f32 %v2649_v51, %v1368_v63 }
 0x7e9   :  { %1534 = vst [vmem:[%s2864_s5 + $0x28] sm:$0xff] %v1369_v9 }
 0x7ea   :  { %1550 = vst [vmem:[%s2864_s5 + $0xa8] sm:$0xff] %v1369_v9 }
 0x7eb   :  { %1566 = vst [vmem:[%s2864_s5 + $0x128] sm:$0xff] %v1369_v9 }
 0x7ec   :  { %1582 = vst [vmem:[%s2864_s5 + $0x1a8] sm:$0xff] %v1369_v9 }
 0x7ee   :  { %v1371_v1 = vpop.f32.mrf.mxu3 }
 0x7ef   :  { %v1372_v25 = vadd.f32 %v2649_v51, %v1371_v1 }
 0x7f1   :  { %1535 = vst [vmem:[%s2864_s5 + $0x30] sm:$0xff] %v1372_v25 }
 0x7f2   :  { %1551 = vst [vmem:[%s2864_s5 + $0xb0] sm:$0xff] %v1372_v25 }
 0x7f3   :  { %1567 = vst [vmem:[%s2864_s5 + $0x130] sm:$0xff] %v1372_v25 }
 0x7f4   :  { %1583 = vst [vmem:[%s2864_s5 + $0x1b0] sm:$0xff] %v1372_v25 }
 0x7f6   :  { %v1374_v30 = vpop.f32.mrf.mxu3 }
 0x7f7   :  { %v1375_v35 = vadd.f32 %v2649_v51, %v1374_v30 }
 0x7f9   :  { %1536 = vst [vmem:[%s2864_s5 + $0x38] sm:$0xff] %v1375_v35 }
 0x7fa   :  { %1552 = vst [vmem:[%s2864_s5 + $0xb8] sm:$0xff] %v1375_v35 }
 0x7fb   :  { %1568 = vst [vmem:[%s2864_s5 + $0x138] sm:$0xff] %v1375_v35 }
 0x7fc   :  { %1584 = vst [vmem:[%s2864_s5 + $0x1b8] sm:$0xff] %v1375_v35 }
 0x7fe   :  { %v1377_v2 = vpop.f32.mrf.mxu3 }
 0x7ff   :  { %v1378_v12 = vadd.f32 %v2649_v51, %v1377_v2 }
 0x801   :  { %1537 = vst [vmem:[%s2864_s5 + $0x40] sm:$0xff] %v1378_v12 }
 0x802   :  { %1553 = vst [vmem:[%s2864_s5 + $0xc0] sm:$0xff] %v1378_v12 }
 0x803   :  { %1569 = vst [vmem:[%s2864_s5 + $0x140] sm:$0xff] %v1378_v12 }
 0x804   :  { %1585 = vst [vmem:[%s2864_s5 + $0x1c0] sm:$0xff] %v1378_v12 }
 0x806   :  { %v1380_v11 = vpop.f32.mrf.mxu3 }
 0x807   :  { %v1381_v5 = vadd.f32 %v2649_v51, %v1380_v11 }
 0x809   :  { %1538 = vst [vmem:[%s2864_s5 + $0x48] sm:$0xff] %v1381_v5 }
 0x80a   :  { %1554 = vst [vmem:[%s2864_s5 + $0xc8] sm:$0xff] %v1381_v5 }
 0x80b   :  { %1570 = vst [vmem:[%s2864_s5 + $0x148] sm:$0xff] %v1381_v5 }
 0x80c   :  { %1586 = vst [vmem:[%s2864_s5 + $0x1c8] sm:$0xff] %v1381_v5 }
 0x80e   :  { %v1383_v7 = vpop.f32.mrf.mxu3 }
 0x80f   :  { %v1384_v10 = vadd.f32 %v2649_v51, %v1383_v7 }
 0x811   :  { %1539 = vst [vmem:[%s2864_s5 + $0x50] sm:$0xff] %v1384_v10 }
 0x812   :  { %1555 = vst [vmem:[%s2864_s5 + $0xd0] sm:$0xff] %v1384_v10 }
 0x813   :  { %1571 = vst [vmem:[%s2864_s5 + $0x150] sm:$0xff] %v1384_v10 }
 0x814   :  { %1587 = vst [vmem:[%s2864_s5 + $0x1d0] sm:$0xff] %v1384_v10 }
 0x816   :  { %v1386_v49 = vpop.f32.mrf.mxu3 }
 0x817   :  { %v1387_v56 = vadd.f32 %v2649_v51, %v1386_v49 }
 0x819   :  { %1540 = vst [vmem:[%s2864_s5 + $0x58] sm:$0xff] %v1387_v56 }
 0x81a   :  { %1556 = vst [vmem:[%s2864_s5 + $0xd8] sm:$0xff] %v1387_v56 }
 0x81b   :  { %1572 = vst [vmem:[%s2864_s5 + $0x158] sm:$0xff] %v1387_v56 }
 0x81c   :  { %1588 = vst [vmem:[%s2864_s5 + $0x1d8] sm:$0xff] %v1387_v56 }
 0x81e   :  { %v1389_v58 = vpop.f32.mrf.mxu3 }
 0x81f   :  { %v1390_v29 = vadd.f32 %v2649_v51, %v1389_v58 }
 0x821   :  { %1541 = vst [vmem:[%s2864_s5 + $0x60] sm:$0xff] %v1390_v29 }
 0x822   :  { %1557 = vst [vmem:[%s2864_s5 + $0xe0] sm:$0xff] %v1390_v29 }
 0x823   :  { %1573 = vst [vmem:[%s2864_s5 + $0x160] sm:$0xff] %v1390_v29 }
 0x824   :  { %1589 = vst [vmem:[%s2864_s5 + $0x1e0] sm:$0xff] %v1390_v29 }
 0x826   :  { %v1392_v62 = vpop.f32.mrf.mxu3 }
 0x827   :  { %v1393_v33 = vadd.f32 %v2649_v51, %v1392_v62 }
 0x829   :  { %1542 = vst [vmem:[%s2864_s5 + $0x68] sm:$0xff] %v1393_v33 }
 0x82a   :  { %1558 = vst [vmem:[%s2864_s5 + $0xe8] sm:$0xff] %v1393_v33 }
 0x82b   :  { %1574 = vst [vmem:[%s2864_s5 + $0x168] sm:$0xff] %v1393_v33 }
 0x82c   :  { %1590 = vst [vmem:[%s2864_s5 + $0x1e8] sm:$0xff] %v1393_v33 }
 0x82e   :  { %v1395_v34 = vpop.f32.mrf.mxu3 }
 0x82f   :  { %v1396_v20 = vadd.f32 %v2649_v51, %v1395_v34 }
 0x831   :  { %1543 = vst [vmem:[%s2864_s5 + $0x70] sm:$0xff] %v1396_v20 }
 0x832   :  { %1559 = vst [vmem:[%s2864_s5 + $0xf0] sm:$0xff] %v1396_v20 }
 0x833   :  { %1575 = vst [vmem:[%s2864_s5 + $0x170] sm:$0xff] %v1396_v20 }
 0x834   :  { %1591 = vst [vmem:[%s2864_s5 + $0x1f0] sm:$0xff] %v1396_v20 }
 0x836   :  { %v1398_v36 = vpop.f32.mrf.mxu3 }
 0x837   :  { %v1399_v38 = vadd.f32 %v2649_v51, %v1398_v36 }
 0x839   :  { %1544 = vst [vmem:[%s2864_s5 + $0x78] sm:$0xff] %v1399_v38 }
 0x83a   :  { %1560 = vst [vmem:[%s2864_s5 + $0xf8] sm:$0xff] %v1399_v38 }
 0x83b   :  { %1576 = vst [vmem:[%s2864_s5 + $0x178] sm:$0xff] %v1399_v38 }
 0x83c   :  { %1592 = vst [vmem:[%s2864_s5 + $0x1f8] sm:$0xff] %v1399_v38 }

</bundles_post_ra>
